<compile_context>
chip_gen: v7x
topology: tpu7x:2x2x1
jax: 0.10.0
libtpu: 0.0.40
codegen_flags: <defaults>
</compile_context>

<pallas_src>
import jax
import jax.numpy as jnp
from jax.experimental import pallas as pl
from jax.experimental.pallas import tpu as pltpu

# Logical sizes (from the PyTorch module).
IN_FEATURES = 64
H1 = 500
LATENT = 100

# Lane-padded sizes.
IN_PAD = 128
H1_PAD = 512
LAT_PAD = 128

# Rows processed per grid step.
BATCH_TILE = 128


def vae_kernel(x_ref,
               w1_ref, b1_ref,
               wenc_ref, benc_ref,
               w3_ref, b3_ref,
               w4_ref, b4_ref,
               eps_ref,
               recon_ref, mu_ref, logvar_ref):
    # Activations cast to bf16 for the MXU; accumulation stays f32.
    x = x_ref[...].astype(jnp.bfloat16)

    # encode: fc1 + relu
    h1 = jnp.dot(x, w1_ref[...], preferred_element_type=jnp.float32) + b1_ref[...]
    h1 = jnp.maximum(h1, 0.0).astype(jnp.bfloat16)

    # fc21 and fc22 fused into one matmul -> (tile, 2*LAT_PAD), slice at lane-tile boundary.
    enc = jnp.dot(h1, wenc_ref[...], preferred_element_type=jnp.float32) + benc_ref[...]
    mu = enc[:, :LAT_PAD]
    logvar = enc[:, LAT_PAD:]

    # reparametrize: std = exp(0.5 * logvar); z = eps * std + mu
    std = jnp.exp(0.5 * logvar)
    z = (eps_ref[...] * std + mu).astype(jnp.bfloat16)

    # decode: fc3 + relu, fc4 + sigmoid
    h3 = jnp.dot(z, w3_ref[...], preferred_element_type=jnp.float32) + b3_ref[...]
    h3 = jnp.maximum(h3, 0.0).astype(jnp.bfloat16)
    logits = jnp.dot(h3, w4_ref[...], preferred_element_type=jnp.float32) + b4_ref[...]
    # sigmoid = 1 / (1 + exp(-x)); exp + approx reciprocal both run on the EUP slot.
    recon = pl.reciprocal(1.0 + jnp.exp(-logits), approx=True)

    recon_ref[...] = recon
    mu_ref[...] = mu
    logvar_ref[...] = logvar


@jax.jit
def vae_forward(x, kparams, eps):
    """Fused VAE forward. kparams: padded, pre-transposed bf16 weights + f32 biases."""
    batch = x.shape[0]
    b_pad = pl.cdiv(batch, BATCH_TILE) * BATCH_TILE

    # Zero-pad batch rows and feature lanes (zeros contribute nothing to valid outputs).
    x_p = jnp.zeros((b_pad, IN_PAD), jnp.float32).at[:batch, :x.shape[1]].set(x)
    eps_p = jnp.zeros((b_pad, LAT_PAD), jnp.float32).at[:batch, :eps.shape[1]].set(eps)

    grid = (b_pad // BATCH_TILE,)

    def rows(cols):  # batch-tiled operands
        return pl.BlockSpec((BATCH_TILE, cols), lambda i: (i, 0))

    def resident(shape):  # weights/biases: same block every step -> stay VMEM-resident
        return pl.BlockSpec(shape, lambda i: (0, 0))

    out_shapes = (
        jax.ShapeDtypeStruct((b_pad, IN_PAD), jnp.float32),   # recon (padded)
        jax.ShapeDtypeStruct((b_pad, LAT_PAD), jnp.float32),  # mu (padded)
        jax.ShapeDtypeStruct((b_pad, LAT_PAD), jnp.float32),  # logvar (padded)
    )

    recon, mu, logvar = pl.pallas_call(
        vae_kernel,
        out_shape=out_shapes,
        grid_spec=pltpu.PrefetchScalarGridSpec(
            num_scalar_prefetch=0,
            grid=grid,
            in_specs=[
                rows(IN_PAD),                       # x
                resident((IN_PAD, H1_PAD)),         # w1
                resident((1, H1_PAD)),              # b1
                resident((H1_PAD, 2 * LAT_PAD)),    # w_enc (fc21 | fc22)
                resident((1, 2 * LAT_PAD)),         # b_enc
                resident((LAT_PAD, H1_PAD)),        # w3
                resident((1, H1_PAD)),              # b3
                resident((H1_PAD, IN_PAD)),         # w4
                resident((1, IN_PAD)),              # b4
                rows(LAT_PAD),                      # eps
            ],
            out_specs=(rows(IN_PAD), rows(LAT_PAD), rows(LAT_PAD)),
        ),
        compiler_params=pltpu.CompilerParams(
            dimension_semantics=("parallel",),      # batch axis shards across TCs on v7x
            vmem_limit_bytes=8 << 20,               # ~2 MiB footprint; leave headroom
        ),
    )(x_p,
      kparams["w1"], kparams["b1"],
      kparams["w_enc"], kparams["b_enc"],
      kparams["w3"], kparams["b3"],
      kparams["w4"], kparams["b4"],
      eps_p)

    # Slice back to logical sizes.
    return (recon[:batch, :IN_FEATURES],
            mu[:batch, :LATENT],
            logvar[:batch, :LATENT])


# ----------------------------- parameter setup -----------------------------

def init_linear(key, fan_in, fan_out):
    """PyTorch nn.Linear init: U(-1/sqrt(fan_in), 1/sqrt(fan_in)).
    Weight returned transposed to (fan_in, fan_out); bias as (1, fan_out)."""
    kw, kb = jax.random.split(key)
    bound = 1.0 / jnp.sqrt(jnp.float32(fan_in))
    w = jax.random.uniform(kw, (fan_in, fan_out), jnp.float32, -bound, bound)
    b = jax.random.uniform(kb, (1, fan_out), jnp.float32, -bound, bound)
    return w, b


def init_params(key, in_features):
    k1, k21, k22, k3, k4 = jax.random.split(key, 5)
    w1, b1 = init_linear(k1, in_features, H1)
    w21, b21 = init_linear(k21, H1, LATENT)
    w22, b22 = init_linear(k22, H1, LATENT)
    w3, b3 = init_linear(k3, LATENT, H1)
    w4, b4 = init_linear(k4, H1, in_features)
    return dict(w1=w1, b1=b1, w21=w21, b21=b21, w22=w22, b22=b22,
                w3=w3, b3=b3, w4=w4, b4=b4)


def pack_kernel_params(params):
    """Zero-pad to lane multiples, fuse fc21/fc22, cast weights to bf16 (biases f32)."""
    def pad2(a, rows, cols):
        out = jnp.zeros((rows, cols), a.dtype)
        return out.at[:a.shape[0], :a.shape[1]].set(a)

    w1 = pad2(params["w1"], IN_PAD, H1_PAD).astype(jnp.bfloat16)
    b1 = pad2(params["b1"], 1, H1_PAD)
    w_enc = jnp.concatenate(
        [pad2(params["w21"], H1_PAD, LAT_PAD), pad2(params["w22"], H1_PAD, LAT_PAD)],
        axis=1).astype(jnp.bfloat16)
    b_enc = jnp.concatenate(
        [pad2(params["b21"], 1, LAT_PAD), pad2(params["b22"], 1, LAT_PAD)], axis=1)
    w3 = pad2(params["w3"], LAT_PAD, H1_PAD).astype(jnp.bfloat16)
    b3 = pad2(params["b3"], 1, H1_PAD)
    w4 = pad2(params["w4"], H1_PAD, IN_PAD).astype(jnp.bfloat16)
    b4 = pad2(params["b4"], 1, IN_PAD)
    return dict(w1=w1, b1=b1, w_enc=w_enc, b_enc=b_enc, w3=w3, b3=b3, w4=w4, b4=b4)


def reference_forward(x, params, eps):
    """Plain-JAX reference matching the kernel's bf16-weight / f32-accumulate math."""
    def dot_bf16(a, w):
        return jnp.dot(a.astype(jnp.bfloat16), w.astype(jnp.bfloat16),
                       preferred_element_type=jnp.float32)

    h1 = jax.nn.relu(dot_bf16(x, params["w1"]) + params["b1"])
    mu = dot_bf16(h1, params["w21"]) + params["b21"]
    logvar = dot_bf16(h1, params["w22"]) + params["b22"]
    std = jnp.exp(0.5 * logvar)
    z = eps * std + mu
    h3 = jax.nn.relu(dot_bf16(z, params["w3"]) + params["b3"])
    recon = jax.nn.sigmoid(dot_bf16(h3, params["w4"]) + params["b4"])
    return recon, mu, logvar


if __name__ == "__main__":
    key = jax.random.PRNGKey(0)
    k_x, k_p, k_eps = jax.random.split(key, 3)

    BATCH = 200  # exercises batch padding (200 -> 256) and a 2-step parallel grid
    x = jax.random.normal(k_x, (BATCH, IN_FEATURES), jnp.float32)
    params = init_params(k_p, IN_FEATURES)
    # eps ~ N(0, 1), generated outside the kernel (mirrors torch.FloatTensor(...).normal_()).
    eps = jax.random.normal(k_eps, (BATCH, LATENT), jnp.float32)

    kparams = pack_kernel_params(params)
    recon, mu, logvar = vae_forward(x, kparams, eps)
    jax.block_until_ready((recon, mu, logvar))

    assert recon.shape == (BATCH, IN_FEATURES)
    assert mu.shape == (BATCH, LATENT) and logvar.shape == (BATCH, LATENT)

    # Correctness check against a plain-JAX reference with matching bf16 matmul semantics.
    r_ref, mu_ref, lv_ref = reference_forward(x, params, eps)
    assert jnp.allclose(mu, mu_ref, atol=5e-3, rtol=5e-3)
    assert jnp.allclose(logvar, lv_ref, atol=5e-3, rtol=5e-3)
    # recon additionally goes through the approximate EUP reciprocal in the kernel.
    assert jnp.allclose(recon, r_ref, atol=1e-2, rtol=1e-2)

    print("KERNEL_OK")
</pallas_src>

<mosaic_0001>
module attributes {stable_mosaic.version = 11 : i64} {
  func.func @vae_kernel(%arg0: i32, %arg1: memref<128x128xf32, #tpu.memory_space<vmem>>, %arg2: memref<128x512xbf16, #tpu.memory_space<vmem>>, %arg3: memref<1x512xf32, #tpu.memory_space<vmem>>, %arg4: memref<512x256xbf16, #tpu.memory_space<vmem>>, %arg5: memref<1x256xf32, #tpu.memory_space<vmem>>, %arg6: memref<128x512xbf16, #tpu.memory_space<vmem>>, %arg7: memref<1x512xf32, #tpu.memory_space<vmem>>, %arg8: memref<512x128xbf16, #tpu.memory_space<vmem>>, %arg9: memref<1x128xf32, #tpu.memory_space<vmem>>, %arg10: memref<128x128xf32, #tpu.memory_space<vmem>>, %arg11: memref<128x128xf32, #tpu.memory_space<vmem>>, %arg12: memref<128x128xf32, #tpu.memory_space<vmem>>, %arg13: memref<128x128xf32, #tpu.memory_space<vmem>>) attributes {dimension_semantics = [#tpu.dimension_semantics<parallel>], iteration_bounds = array<i64: 2>, scalar_prefetch = 0 : i64, scratch_operands = 0 : i64, tpu.core_type = #tpu.core_type<tc>, window_params = [{transform_indices = @transform_0, window_bounds = array<i64: 128, 128>}, {pipeline_mode = #tpu.pipeline_mode<synchronous>, transform_indices = @transform_1, window_bounds = array<i64: 128, 512>}, {pipeline_mode = #tpu.pipeline_mode<synchronous>, transform_indices = @transform_2, window_bounds = array<i64: 1, 512>}, {pipeline_mode = #tpu.pipeline_mode<synchronous>, transform_indices = @transform_3, window_bounds = array<i64: 512, 256>}, {pipeline_mode = #tpu.pipeline_mode<synchronous>, transform_indices = @transform_4, window_bounds = array<i64: 1, 256>}, {pipeline_mode = #tpu.pipeline_mode<synchronous>, transform_indices = @transform_5, window_bounds = array<i64: 128, 512>}, {pipeline_mode = #tpu.pipeline_mode<synchronous>, transform_indices = @transform_6, window_bounds = array<i64: 1, 512>}, {pipeline_mode = #tpu.pipeline_mode<synchronous>, transform_indices = @transform_7, window_bounds = array<i64: 512, 128>}, {pipeline_mode = #tpu.pipeline_mode<synchronous>, transform_indices = @transform_8, window_bounds = array<i64: 1, 128>}, {transform_indices = @transform_9, window_bounds = array<i64: 128, 128>}, {transform_indices = @transform_10, window_bounds = array<i64: 128, 128>}, {transform_indices = @transform_11, window_bounds = array<i64: 128, 128>}, {transform_indices = @transform_12, window_bounds = array<i64: 128, 128>}]} {
    %c0 = arith.constant 0 : index
    %c0_0 = arith.constant 0 : index
    %0 = vector.load %arg1[%c0, %c0_0] : memref<128x128xf32, #tpu.memory_space<vmem>>, vector<128x128xf32>
    %1 = arith.truncf %0 : vector<128x128xf32> to vector<128x128xbf16>
    %c0_1 = arith.constant 0 : index
    %c0_2 = arith.constant 0 : index
    %2 = vector.load %arg2[%c0_1, %c0_2] : memref<128x512xbf16, #tpu.memory_space<vmem>>, vector<128x512xbf16>
    %cst = arith.constant dense<0.000000e+00> : vector<128x512xf32>
    %3 = tpu.matmul %1, %2, %cst {dimension_numbers = #tpu.dot_dimension_numbers<[1], [0], [0], [1], [0, 0, 1, 1], [], []>} : vector<128x128xbf16>, vector<128x512xbf16>, vector<128x512xf32> -> vector<128x512xf32>
    %c0_3 = arith.constant 0 : index
    %c0_4 = arith.constant 0 : index
    %4 = vector.load %arg3[%c0_3, %c0_4] : memref<1x512xf32, #tpu.memory_space<vmem>>, vector<1x512xf32>
    %5 = vector.broadcast %4 : vector<1x512xf32> to vector<128x512xf32>
    %6 = arith.addf %3, %5 : vector<128x512xf32>
    %cst_5 = arith.constant 0.000000e+00 : f32
    %7 = vector.broadcast %cst_5 : f32 to vector<128x512xf32>
    %8 = arith.maximumf %6, %7 : vector<128x512xf32>
    %9 = arith.truncf %8 : vector<128x512xf32> to vector<128x512xbf16>
    %c0_6 = arith.constant 0 : index
    %c0_7 = arith.constant 0 : index
    %10 = vector.load %arg4[%c0_6, %c0_7] : memref<512x256xbf16, #tpu.memory_space<vmem>>, vector<512x256xbf16>
    %cst_8 = arith.constant dense<0.000000e+00> : vector<128x256xf32>
    %11 = tpu.matmul %9, %10, %cst_8 {dimension_numbers = #tpu.dot_dimension_numbers<[1], [0], [0], [1], [0, 0, 1, 1], [], []>} : vector<128x512xbf16>, vector<512x256xbf16>, vector<128x256xf32> -> vector<128x256xf32>
    %c0_9 = arith.constant 0 : index
    %c0_10 = arith.constant 0 : index
    %12 = vector.load %arg5[%c0_9, %c0_10] : memref<1x256xf32, #tpu.memory_space<vmem>>, vector<1x256xf32>
    %13 = vector.broadcast %12 : vector<1x256xf32> to vector<128x256xf32>
    %14 = arith.addf %11, %13 : vector<128x256xf32>
    %15 = vector.extract_strided_slice %14 {offsets = [0, 0], sizes = [128, 128], strides = [1, 1]} : vector<128x256xf32> to vector<128x128xf32>
    %16 = vector.extract_strided_slice %14 {offsets = [0, 128], sizes = [128, 128], strides = [1, 1]} : vector<128x256xf32> to vector<128x128xf32>
    %cst_11 = arith.constant 5.000000e-01 : f32
    %17 = vector.broadcast %cst_11 : f32 to vector<128x128xf32>
    %18 = arith.mulf %17, %16 : vector<128x128xf32>
    %19 = math.exp %18 : vector<128x128xf32>
    %c0_12 = arith.constant 0 : index
    %c0_13 = arith.constant 0 : index
    %20 = vector.load %arg10[%c0_12, %c0_13] : memref<128x128xf32, #tpu.memory_space<vmem>>, vector<128x128xf32>
    %21 = arith.mulf %20, %19 : vector<128x128xf32>
    %22 = arith.addf %21, %15 : vector<128x128xf32>
    %23 = arith.truncf %22 : vector<128x128xf32> to vector<128x128xbf16>
    %c0_14 = arith.constant 0 : index
    %c0_15 = arith.constant 0 : index
    %24 = vector.load %arg6[%c0_14, %c0_15] : memref<128x512xbf16, #tpu.memory_space<vmem>>, vector<128x512xbf16>
    %cst_16 = arith.constant dense<0.000000e+00> : vector<128x512xf32>
    %25 = tpu.matmul %23, %24, %cst_16 {dimension_numbers = #tpu.dot_dimension_numbers<[1], [0], [0], [1], [0, 0, 1, 1], [], []>} : vector<128x128xbf16>, vector<128x512xbf16>, vector<128x512xf32> -> vector<128x512xf32>
    %c0_17 = arith.constant 0 : index
    %c0_18 = arith.constant 0 : index
    %26 = vector.load %arg7[%c0_17, %c0_18] : memref<1x512xf32, #tpu.memory_space<vmem>>, vector<1x512xf32>
    %27 = vector.broadcast %26 : vector<1x512xf32> to vector<128x512xf32>
    %28 = arith.addf %25, %27 : vector<128x512xf32>
    %cst_19 = arith.constant 0.000000e+00 : f32
    %29 = vector.broadcast %cst_19 : f32 to vector<128x512xf32>
    %30 = arith.maximumf %28, %29 : vector<128x512xf32>
    %31 = arith.truncf %30 : vector<128x512xf32> to vector<128x512xbf16>
    %c0_20 = arith.constant 0 : index
    %c0_21 = arith.constant 0 : index
    %32 = vector.load %arg8[%c0_20, %c0_21] : memref<512x128xbf16, #tpu.memory_space<vmem>>, vector<512x128xbf16>
    %cst_22 = arith.constant dense<0.000000e+00> : vector<128x128xf32>
    %33 = tpu.matmul %31, %32, %cst_22 {dimension_numbers = #tpu.dot_dimension_numbers<[1], [0], [0], [1], [0, 0, 1, 1], [], []>} : vector<128x512xbf16>, vector<512x128xbf16>, vector<128x128xf32> -> vector<128x128xf32>
    %c0_23 = arith.constant 0 : index
    %c0_24 = arith.constant 0 : index
    %34 = vector.load %arg9[%c0_23, %c0_24] : memref<1x128xf32, #tpu.memory_space<vmem>>, vector<1x128xf32>
    %35 = vector.broadcast %34 : vector<1x128xf32> to vector<128x128xf32>
    %36 = arith.addf %33, %35 : vector<128x128xf32>
    %cst_25 = arith.constant 0.000000e+00 : f32
    %37 = vector.broadcast %cst_25 : f32 to vector<128x128xf32>
    %38 = arith.subf %37, %36 : vector<128x128xf32>
    %39 = math.exp %38 : vector<128x128xf32>
    %cst_26 = arith.constant 1.000000e+00 : f32
    %40 = vector.broadcast %cst_26 : f32 to vector<128x128xf32>
    %41 = arith.addf %40, %39 : vector<128x128xf32>
    %42 = tpu.reciprocal %41 {approx = true} : vector<128x128xf32> -> vector<128x128xf32>
    %c0_27 = arith.constant 0 : index
    %c0_28 = arith.constant 0 : index
    %43 = vector.load %arg11[%c0_27, %c0_28] : memref<128x128xf32, #tpu.memory_space<vmem>>, vector<128x128xf32>
    tpu.vector_store %arg11[%c0_27, %c0_28], %42 {strides = array<i32>} : memref<128x128xf32, #tpu.memory_space<vmem>>, vector<128x128xf32>,
    %c0_29 = arith.constant 0 : index
    %c0_30 = arith.constant 0 : index
    %44 = vector.load %arg12[%c0_29, %c0_30] : memref<128x128xf32, #tpu.memory_space<vmem>>, vector<128x128xf32>
    tpu.vector_store %arg12[%c0_29, %c0_30], %15 {strides = array<i32>} : memref<128x128xf32, #tpu.memory_space<vmem>>, vector<128x128xf32>,
    %c0_31 = arith.constant 0 : index
    %c0_32 = arith.constant 0 : index
    %45 = vector.load %arg13[%c0_31, %c0_32] : memref<128x128xf32, #tpu.memory_space<vmem>>, vector<128x128xf32>
    tpu.vector_store %arg13[%c0_31, %c0_32], %16 {strides = array<i32>} : memref<128x128xf32, #tpu.memory_space<vmem>>, vector<128x128xf32>,
    return
  }
  func.func @transform_0(%arg0: i32) -> (i32, i32) {
    %c0_i32 = arith.constant 0 : i32
    %c0_i32_0 = arith.constant 0 : i32
    return %arg0, %c0_i32 : i32, i32
  }
  func.func @transform_1(%arg0: i32) -> (i32, i32) {
    %c0_i32 = arith.constant 0 : i32
    %c0_i32_0 = arith.constant 0 : i32
    %c0_i32_1 = arith.constant 0 : i32
    return %c0_i32, %c0_i32_0 : i32, i32
  }
  func.func @transform_2(%arg0: i32) -> (i32, i32) {
    %c0_i32 = arith.constant 0 : i32
    %c0_i32_0 = arith.constant 0 : i32
    %c0_i32_1 = arith.constant 0 : i32
    return %c0_i32, %c0_i32_0 : i32, i32
  }
  func.func @transform_3(%arg0: i32) -> (i32, i32) {
    %c0_i32 = arith.constant 0 : i32
    %c0_i32_0 = arith.constant 0 : i32
    %c0_i32_1 = arith.constant 0 : i32
    return %c0_i32, %c0_i32_0 : i32, i32
  }
  func.func @transform_4(%arg0: i32) -> (i32, i32) {
    %c0_i32 = arith.constant 0 : i32
    %c0_i32_0 = arith.constant 0 : i32
    %c0_i32_1 = arith.constant 0 : i32
    return %c0_i32, %c0_i32_0 : i32, i32
  }
  func.func @transform_5(%arg0: i32) -> (i32, i32) {
    %c0_i32 = arith.constant 0 : i32
    %c0_i32_0 = arith.constant 0 : i32
    %c0_i32_1 = arith.constant 0 : i32
    return %c0_i32, %c0_i32_0 : i32, i32
  }
  func.func @transform_6(%arg0: i32) -> (i32, i32) {
    %c0_i32 = arith.constant 0 : i32
    %c0_i32_0 = arith.constant 0 : i32
    %c0_i32_1 = arith.constant 0 : i32
    return %c0_i32, %c0_i32_0 : i32, i32
  }
  func.func @transform_7(%arg0: i32) -> (i32, i32) {
    %c0_i32 = arith.constant 0 : i32
    %c0_i32_0 = arith.constant 0 : i32
    %c0_i32_1 = arith.constant 0 : i32
    return %c0_i32, %c0_i32_0 : i32, i32
  }
  func.func @transform_8(%arg0: i32) -> (i32, i32) {
    %c0_i32 = arith.constant 0 : i32
    %c0_i32_0 = arith.constant 0 : i32
    %c0_i32_1 = arith.constant 0 : i32
    return %c0_i32, %c0_i32_0 : i32, i32
  }
  func.func @transform_9(%arg0: i32) -> (i32, i32) {
    %c0_i32 = arith.constant 0 : i32
    %c0_i32_0 = arith.constant 0 : i32
    return %arg0, %c0_i32 : i32, i32
  }
  func.func @transform_10(%arg0: i32) -> (i32, i32) {
    %c0_i32 = arith.constant 0 : i32
    %c0_i32_0 = arith.constant 0 : i32
    return %arg0, %c0_i32 : i32, i32
  }
  func.func @transform_11(%arg0: i32) -> (i32, i32) {
    %c0_i32 = arith.constant 0 : i32
    %c0_i32_0 = arith.constant 0 : i32
    return %arg0, %c0_i32 : i32, i32
  }
  func.func @transform_12(%arg0: i32) -> (i32, i32) {
    %c0_i32 = arith.constant 0 : i32
    %c0_i32_0 = arith.constant 0 : i32
    return %arg0, %c0_i32 : i32, i32
  }
}

</mosaic_0001>

<bundles_post_ra>
// kernel: vae_forward.1
= control target key start
LH: loop header
LB: loop body
LE: loop exit
PB: predicated region body
PF: predicated region fallthrough
CT: control target
= control target key end

     0   :  { %18 = vsyncpa [#allocation3], 0  ;;  %s3860_s21 = smov 0   ;;  %s4811_s0 = inlined_call_operand.vmem [shape: f32[256,128], index: 0, kind: input, shape index: {}]   ;;  %s4812_s1 = inlined_call_operand.vmem [shape: bf16[128,512], index: 1, kind: input, shape index: {}]   ;;  %s4813_s2 = inlined_call_operand.vmem [shape: f32[1,512], index: 2, kind: input, shape index: {}]   ;;  %s4814_s3 = inlined_call_operand.vmem [shape: bf16[512,256], index: 3, kind: input, shape index: {}]   ;;  %s4815_s4 = inlined_call_operand.vmem [shape: f32[1,256], index: 4, kind: input, shape index: {}]   ;;  %s4816_s5 = inlined_call_operand.vmem [shape: bf16[128,512], index: 5, kind: input, shape index: {}]   ;;  %s4817_s6 = inlined_call_operand.vmem [shape: f32[1,512], index: 6, kind: input, shape index: {}]   ;;  %s4818_s7 = inlined_call_operand.hbm [shape: bf16[512,128], index: 7, kind: input, shape index: {}]   ;;  %s4819_s8 = inlined_call_operand.vmem [shape: f32[1,128], index: 8, kind: input, shape index: {}]   ;;  %s4820_s9 = inlined_call_operand.vmem [shape: f32[256,128], index: 9, kind: input, shape index: {}]   ;;  %s4821_s10 = inlined_call_operand.vmem [shape: f32[256,128], index: 10, kind: output, shape index: {0}]   ;;  %s4822_s11 = inlined_call_operand.vmem [shape: f32[256,128], index: 11, kind: output, shape index: {1}]   ;;  %s4823_s12 = inlined_call_operand.vmem [shape: f32[256,128], index: 12, kind: output, shape index: {2}]  }
   0x1 LB: > { %s3037_s22 = sadd.s32 4294967295, %s3789_s21   ;;  %p3039_p0 = scmp.ge.s32.totalorder %s3789_s21, 1  ;;  %s3789_s21 = sphi %s3860_s21, %s24_s21  }
   0x2   : > { %p327_p1 = scmp.lt.s32.totalorder %s3789_s21, 3  ;;  %s3791_s23 = smov [#allocation2]  }
   0x3   : > { %s357_s24 = sshll.u32 %s3791_s23, 4  ;;  %p3874_p3 = scmp.eq.s32.totalorder %s3037_s22, 0  ;;  %s358_s24 = int_to_ptr.vmem [resolvable:$true] %s357_s24 }
   0x4   : > { %p3868_p2 = pnand %p3039_p0, %p327_p1  ;;  %s3751_s30 = scalar_lea.hbm %s4818_s7, 4096 }
   0x5   : > { %s4828_s26 = scalar_select %p3874_p3, 1, 0 }
   0x6   : > { %s4827_s25 = scalar_select %p3868_p2, 1, 0 }
   0x7   : > { %p3413_p4 = pneg %p3868_p2  ;;  %p3752_p6 = scmp.ne.s32.totalorder %s4818_s7, %s3751_s30 }
   0x8   : > { %p3758_p10 = scmp.lt.u32.totalorder %s3751_s30, %s4818_s7 }
   0x9   : > { %p3882_p5 = pnand %p3874_p3, %p3413_p4 }
   0xb   : > { %p3753_p7 = pneg %p3882_p5 }
   0xd   : > { %p3754_p8 = pnand %p3753_p7, %p3752_p6 }
   0xf   : > { %p3755_p9 = pneg %p3754_p8 }
  0x11   : > { %p3760_p11 = pnand %p3758_p10, %p3755_p9 }
  0x13   : > { %3763 = shalt.err (!%p3760_p11)
}
  0x14   : > { %s3764_s17 = scalar_lea.vmem %s358_s24, 4096  ;;  %p3772_p1 = scmp.lt.s32.totalorder %s358_s24, %s358_s24 }
  0x15   : > { %p3765_p12 = scmp.ne.s32.totalorder %s358_s24, %s3764_s17  ;;  %p3773_p4 = scmp.lt.s32.totalorder %s3764_s17, %s3764_s17 }
  0x17   : > { %p3767_p13 = pnand %p3765_p12, %p3753_p7  ;;  %p3774_p3 = por %p3773_p4, %p3772_p1 }
  0x19   : > { %p3768_p0 = pneg %p3767_p13 }
  0x1b   : > { %p3775_p2 = pnand %p3774_p3, %p3768_p0 }
  0x1d   : > { %3778 = shalt.err (!%p3775_p2)
}
  0x1e   : > { %s3792_s18 = smov 64   ;;  %s3793_s19 = smov 4  }
  0x1f   : > { %3416 = dma.hbm_to_vmem [thread:$0]  (!%p3882_p5), %s4818_s7, 4096, %s358_s24, [#allocation3], %s3792_s18, %s3792_s18, %s3793_s19  }
  0x20   : > { %p4830_p6 = scmp.ne.s32.totalorder %s4827_s25, 0 }
  0x21   : > { %p4831_p8 = scmp.ne.s32.totalorder (!%p4830_p6), %s4828_s26, 0 }
  0x22   : > { %394 = sbr.rel (%p4830_p6) target bundleno = 1190 (0x4a6), region = 60 }
  0x29   : > { %3784 = dma.done.wait (%p4831_p8), [#allocation3], 4096  }
  0x2a   : > { %3786 = vsyncadd (%p4831_p8), [#allocation3], 4294963200  ;;  %v3794_v0 = vmov 0   ;;  %v3431_v1 = vld [vmem:[%s4812_s1 + $0x4] ss:$16 sps:$4 sm:$0xff]   ;;  %s3044_s20 = sshll.u32 %s3037_s22, 4 }
  0x2b   : > { %752 = vmatprep.mubr.bf16.mxu0 %v3794_v0  ;;  %865 = vmatprep.mubr.bf16.mxu1 %v3794_v0  ;;  %v3433_v2 = vld [vmem:[%s4812_s1] ss:$16 sps:$4 sm:$0xff]   ;;  %v3434_v3 = vld [vmem:[%s4812_s1 + $0x24] ss:$16 sps:$4 sm:$0xff]   ;;  %p452_p2 = scmp.lt.s32.totalorder %s3044_s20, 31 }
  0x2c   : > { %720 = vmatprep.subr.bf16.mxu0 %v3431_v1  ;;  %v3436_v4 = vld [vmem:[%s4812_s1 + $0x20] ss:$16 sps:$4 sm:$0xff]   ;;  %v3437_v5 = vld [vmem:[%s4812_s1 + $0x44] ss:$16 sps:$4 sm:$0xff]   ;;  %v3455_v10 = vld [vmem:[%s4812_s1 + $0xc] ss:$16 sps:$4 sm:$0xff]  }
  0x2d   : > { %721 = vmatpush1.bf16.msra.mxu0 %v3433_v2  ;;  %v3439_v6 = vld [vmem:[%s4812_s1 + $0x40] ss:$16 sps:$4 sm:$0xff]   ;;  %v3440_v7 = vld [vmem:[%s4812_s1 + $0x64] ss:$16 sps:$4 sm:$0xff]   ;;  %v3457_v11 = vld [vmem:[%s4812_s1 + $0x8] ss:$16 sps:$4 sm:$0xff]   ;;  %833 = vmatprep.subr.bf16.mxu1 %v3455_v10 }
  0x2e   : > { %722 = vmatprep.subr.bf16.mxu0 %v3434_v3  ;;  %v3442_v8 = vld [vmem:[%s4812_s1 + $0x60] ss:$16 sps:$4 sm:$0xff]   ;;  %v3443_v9 = vld [vmem:[%s4812_s1 + $0x84] ss:$16 sps:$4 sm:$0xff]   ;;  %v3458_v14 = vld [vmem:[%s4812_s1 + $0x2c] ss:$16 sps:$4 sm:$0xff]   ;;  %834 = vmatpush1.bf16.msra.mxu1 %v3457_v11 }
  0x2f   : > { %v3445_v12 = vld [vmem:[%s4812_s1 + $0x80] ss:$16 sps:$4 sm:$0xff]   ;;  %v3446_v13 = vld [vmem:[%s4812_s1 + $0xa4] ss:$16 sps:$4 sm:$0xff]   ;;  %s4833_s20 = smov (!%p452_p2, %s3044_s20), 31  ;;  %835 = vmatprep.subr.bf16.mxu1 %v3458_v14 }
  0x30   : > { %v3460_v15 = vld [vmem:[%s4812_s1 + $0x28] ss:$16 sps:$4 sm:$0xff]   ;;  %v3461_v16 = vld [vmem:[%s4812_s1 + $0x4c] ss:$16 sps:$4 sm:$0xff]   ;;  %v3448_v17 = vld [vmem:[%s4812_s1 + $0xa0] ss:$16 sps:$4 sm:$0xff]  }
  0x31   : > { %723 = vmatpush1.bf16.msra.mxu0 %v3436_v4  ;;  %v3449_v18 = vld [vmem:[%s4812_s1 + $0xc4] ss:$16 sps:$4 sm:$0xff]   ;;  %s3966_s30 = sshll.u32 %s4833_s20, 3  ;;  %v3463_v19 = vld [vmem:[%s4812_s1 + $0x48] ss:$16 sps:$4 sm:$0xff]  }
  0x32   : > { %724 = vmatprep.subr.bf16.mxu0 %v3437_v5  ;;  %836 = vmatpush1.bf16.msra.mxu1 %v3460_v15  ;;  %v3464_v20 = vld [vmem:[%s4812_s1 + $0x6c] ss:$16 sps:$4 sm:$0xff]   ;;  %v3451_v21 = vld [vmem:[%s4812_s1 + $0xc0] ss:$16 sps:$4 sm:$0xff]   ;;  %v3452_v22 = vld [vmem:[%s4812_s1 + $0xe4] ss:$16 sps:$4 sm:$0xff]   ;;  %s3984_s23 = scalar_lea.vmem %s4811_s0, %s3966_s30  ;;  %s4431_s29 = scalar_lea.vmem %s4823_s12, %s3966_s30 }
  0x33   : > { %837 = vmatprep.subr.bf16.mxu1 %v3461_v16  ;;  %v3466_v23 = vld [vmem:[%s4812_s1 + $0x68] ss:$16 sps:$4 sm:$0xff]   ;;  %v3454_v24 = vld [vmem:[%s4812_s1 + $0xe0] ss:$16 sps:$4 sm:$0xff]   ;;  %v3467_v25 = vld [vmem:[%s4812_s1 + $0x8c] ss:$16 sps:$4 sm:$0xff]   ;;  %s4455_s22 = scalar_lea.vmem %s4820_s9, %s3966_s30  ;;  %s4774_s19 = scalar_lea.vmem %s4821_s10, %s3966_s30 }
  0x34   : > { %v482_v26 = vld [vmem:[%s3984_s23] sm:$0xff]  ;;  %v483_v27 = vld [vmem:[%s3984_s23 + $0x8] sm:$0xff]  ;;  %v3484_v33 = vld [vmem:[%s4814_s3 + $0x14] ss:$8 sps:$4 sm:$0xff]  }
  0x35   : > { %725 = vmatpush1.bf16.msra.mxu0 %v3439_v6  ;;  %v3481_v28 = vld [vmem:[%s4814_s3 + $0x4] ss:$8 sps:$4 sm:$0xff]   ;;  %v3469_v29 = vld [vmem:[%s4812_s1 + $0x88] ss:$16 sps:$4 sm:$0xff]   ;;  %v498_v30 = vpack.c.bf16 %v483_v27, %v482_v26  ;;  %v484_v35 = vld [vmem:[%s3984_s23 + $0x10] sm:$0xff]  ;;  %v540_v27 = vlaneseq }
  0x36   : > { %726 = vmatprep.subr.bf16.mxu0 %v3440_v7  ;;  %838 = vmatpush1.bf16.msra.mxu1 %v3463_v19  ;;  %v3470_v31 = vld [vmem:[%s4812_s1 + $0xac] ss:$16 sps:$4 sm:$0xff]   ;;  %v3479_v32 = vld [vmem:[%s4814_s3] ss:$8 sps:$4 sm:$0xff]   ;;  %v3482_v38 = vld [vmem:[%s4814_s3 + $0x10] ss:$8 sps:$4 sm:$0xff]  }
  0x37   : > { %839 = vmatprep.subr.bf16.mxu1 %v3464_v20  ;;  %v3472_v34 = vld [vmem:[%s4812_s1 + $0xa8] ss:$16 sps:$4 sm:$0xff]   ;;  %v3473_v36 = vld [vmem:[%s4812_s1 + $0xcc] ss:$16 sps:$4 sm:$0xff]   ;;  %v486_v46 = vld [vmem:[%s3984_s23 + $0x20] sm:$0xff] }
  0x38   : > { %v485_v37 = vld [vmem:[%s3984_s23 + $0x18] sm:$0xff]  ;;  %v3487_v39 = vld [vmem:[%s4814_s3 + $0x24] ss:$8 sps:$4 sm:$0xff]   ;;  %v3485_v43 = vld [vmem:[%s4814_s3 + $0x20] ss:$8 sps:$4 sm:$0xff]  }
  0x39   : > { %727 = vmatpush1.bf16.msra.mxu0 %v3442_v8  ;;  %v3475_v40 = vld [vmem:[%s4812_s1 + $0xc8] ss:$16 sps:$4 sm:$0xff]   ;;  %v499_v41 = vpack.c.bf16 %v485_v37, %v484_v35  ;;  %v3476_v42 = vld [vmem:[%s4812_s1 + $0xec] ss:$16 sps:$4 sm:$0xff]   ;;  %v488_v53 = vld [vmem:[%s3984_s23 + $0x30] sm:$0xff] }
  0x3a   : > { %728 = vmatprep.subr.bf16.mxu0 %v3443_v9  ;;  %840 = vmatpush1.bf16.msra.mxu1 %v3466_v23  ;;  %v3490_v44 = vld [vmem:[%s4814_s3 + $0x34] ss:$8 sps:$4 sm:$0xff]   ;;  %v3478_v45 = vld [vmem:[%s4812_s1 + $0xe8] ss:$16 sps:$4 sm:$0xff]   ;;  %v3493_v49 = vld [vmem:[%s4814_s3 + $0x44] ss:$8 sps:$4 sm:$0xff]  }
  0x3b   : > { %841 = vmatprep.subr.bf16.mxu1 %v3467_v25  ;;  %v487_v47 = vld [vmem:[%s3984_s23 + $0x28] sm:$0xff]  ;;  %v3488_v48 = vld [vmem:[%s4814_s3 + $0x30] ss:$8 sps:$4 sm:$0xff]   ;;  %v3496_v52 = vld [vmem:[%s4814_s3 + $0x54] ss:$8 sps:$4 sm:$0xff]  }
  0x3c   : > { %v3491_v50 = vld [vmem:[%s4814_s3 + $0x40] ss:$8 sps:$4 sm:$0xff]   ;;  %v500_v51 = vpack.c.bf16 %v487_v47, %v486_v46  ;;  %v489_v54 = vld [vmem:[%s3984_s23 + $0x38] sm:$0xff]  ;;  %v3499_v56 = vld [vmem:[%s4814_s3 + $0x64] ss:$8 sps:$4 sm:$0xff]  }
  0x3d   : > { %729 = vmatpush1.bf16.msra.mxu0 %v3445_v12  ;;  %v3494_v55 = vld [vmem:[%s4814_s3 + $0x50] ss:$8 sps:$4 sm:$0xff]   ;;  %v3497_v57 = vld [vmem:[%s4814_s3 + $0x60] ss:$8 sps:$4 sm:$0xff]   ;;  %v501_v58 = vpack.c.bf16 %v489_v54, %v488_v53  ;;  %v3502_v59 = vld [vmem:[%s4814_s3 + $0x74] ss:$8 sps:$4 sm:$0xff]  }
  0x3e   : > { %730 = vmatprep.subr.bf16.mxu0 %v3446_v13  ;;  %842 = vmatpush1.bf16.msra.mxu1 %v3469_v29  ;;  %v490_v60 = vld [vmem:[%s3984_s23 + $0x40] sm:$0xff]  ;;  %v491_v61 = vld [vmem:[%s3984_s23 + $0x48] sm:$0xff]  ;;  %v3500_v62 = vld [vmem:[%s4814_s3 + $0x70] ss:$8 sps:$4 sm:$0xff]  }
  0x3f   : > { %843 = vmatprep.subr.bf16.mxu1 %v3470_v31  ;;  %v3505_v63 = vld [vmem:[%s4814_s3 + $0x84] ss:$8 sps:$4 sm:$0xff]   ;;  %v3503_v1 = vld [vmem:[%s4814_s3 + $0x80] ss:$8 sps:$4 sm:$0xff]   ;;  %v502_v2 = vpack.c.bf16 %v491_v61, %v490_v60  ;;  %v3508_v3 = vld [vmem:[%s4814_s3 + $0x94] ss:$8 sps:$4 sm:$0xff]  }
  0x40   : > { %v492_v4 = vld [vmem:[%s3984_s23 + $0x50] sm:$0xff]  ;;  %v493_v5 = vld [vmem:[%s3984_s23 + $0x58] sm:$0xff]  ;;  %v3511_v7 = vld [vmem:[%s4814_s3 + $0xa4] ss:$8 sps:$4 sm:$0xff]  }
  0x41   : > { %731 = vmatpush1.bf16.msra.mxu0 %v3448_v17  ;;  %v3506_v6 = vld [vmem:[%s4814_s3 + $0x90] ss:$8 sps:$4 sm:$0xff]   ;;  %v3509_v8 = vld [vmem:[%s4814_s3 + $0xa0] ss:$8 sps:$4 sm:$0xff]   ;;  %v503_v9 = vpack.c.bf16 %v493_v5, %v492_v4  ;;  %v3514_v10 = vld [vmem:[%s4814_s3 + $0xb4] ss:$8 sps:$4 sm:$0xff]  }
  0x42   : > { %732 = vmatprep.subr.bf16.mxu0 %v3449_v18  ;;  %844 = vmatpush1.bf16.msra.mxu1 %v3472_v34  ;;  %v494_v11 = vld [vmem:[%s3984_s23 + $0x60] sm:$0xff]  ;;  %v495_v12 = vld [vmem:[%s3984_s23 + $0x68] sm:$0xff]  ;;  %v3512_v13 = vld [vmem:[%s4814_s3 + $0xb0] ss:$8 sps:$4 sm:$0xff]  }
  0x43   : > { %845 = vmatprep.subr.bf16.mxu1 %v3473_v36  ;;  %v3517_v14 = vld [vmem:[%s4814_s3 + $0xc4] ss:$8 sps:$4 sm:$0xff]   ;;  %v3515_v15 = vld [vmem:[%s4814_s3 + $0xc0] ss:$8 sps:$4 sm:$0xff]   ;;  %v504_v16 = vpack.c.bf16 %v495_v12, %v494_v11  ;;  %v3520_v17 = vld [vmem:[%s4814_s3 + $0xd4] ss:$8 sps:$4 sm:$0xff]  }
  0x44   : > { %v496_v18 = vld [vmem:[%s3984_s23 + $0x70] sm:$0xff]  ;;  %v497_v19 = vld [vmem:[%s3984_s23 + $0x78] sm:$0xff]  ;;  %v3521_v23 = vld [vmem:[%s4814_s3 + $0xe0] ss:$8 sps:$4 sm:$0xff]   ;;  %s4424_s23 = scalar_lea.vmem %s4822_s11, %s3966_s30 }
  0x45   : > { %733 = vmatpush1.bf16.msra.mxu0 %v3451_v21  ;;  %v3518_v20 = vld [vmem:[%s4814_s3 + $0xd0] ss:$8 sps:$4 sm:$0xff]   ;;  %v505_v21 = vpack.c.bf16 %v497_v19, %v496_v18  ;;  %v3529_v26 = vld [vmem:[%s4814_s3 + $0x104] ss:$8 sps:$4 sm:$0xff]  }
  0x46   : > { %734 = vmatprep.subr.bf16.mxu0 %v3452_v22  ;;  %846 = vmatpush1.bf16.msra.mxu1 %v3475_v40  ;;  %v3523_v22 = vld [vmem:[%s4814_s3 + $0xe4] ss:$8 sps:$4 sm:$0xff]   ;;  %v3524_v25 = vld [vmem:[%s4814_s3 + $0xf0] ss:$8 sps:$4 sm:$0xff]  }
  0x47   : > { %847 = vmatprep.subr.bf16.mxu1 %v3476_v42  ;;  %v3577_v42 = vld [vmem:[%s4816_s5 + $0x4] ss:$16 sps:$4 sm:$0xff]   ;;  %v3530_v5 = vld [vmem:[%s4814_s3 + $0x110] ss:$8 sps:$4 sm:$0xff]  }
  0x49   : > { %735 = vmatpush1.bf16.msra.mxu0 %v3454_v24  ;;  %v3526_v24 = vld [vmem:[%s4814_s3 + $0xf4] ss:$8 sps:$4 sm:$0xff]  }
  0x4a   : > { %1438 = vmatprep.subr.bf16.mxu0 %v3481_v28  ;;  %848 = vmatpush1.bf16.msra.mxu1 %v3478_v45  ;;  %v4146_v28 = vshrl.u32 %v540_v27, 7 }
  0x4b   : > { %1982 = vmatprep.subr.bf16.mxu1 %v3577_v42 }
  0x4c   : > { %753 = vmatmul.mubr.bf16.vlgmr.msra.gmra.mrb[0].mxu0 %v498_v30  ;;  %v4149_v29 = vsub.s32 0, %v4146_v28  ;;  %v4155_v31 = vsub.s32 1, %v4146_v28 }
  0x4d   : > { %762 = vmatprep.mubr.bf16.mxu0 %v3794_v0  ;;  %1439 = vmatpush1.bf16.msra.mxu0 %v3479_v32 }
  0x4e   : > { %1440 = vmatprep.subr.bf16.mxu0 %v3484_v33  ;;  %866 = vmatmul.mubr.bf16.vlgmr.msra.gmra.mrb[0].mxu1 %v498_v30  ;;  %v538_v30 = vld [vmem:[%s4813_s2] sm:$0xf] }
  0x4f   : > { %875 = vmatprep.mubr.bf16.mxu1 %v3794_v0  ;;  %v4158_v32 = vrot.slane %v538_v30, %v4149_v29  ;;  %v4161_v33 = vrot.slane %v538_v30, %v4155_v31 }
  0x51   : > { %1441 = vmatpush1.bf16.msra.mxu0 %v3482_v38 }
  0x52   : > { %1442 = vmatprep.subr.bf16.mxu0 %v3487_v39 }
  0x54   : > { %763 = vmatmul.mubr.bf16.gmra.mrb[4].mxu0 %v499_v41 }
  0x55   : > { %772 = vmatprep.mubr.bf16.mxu0 %v3794_v0  ;;  %1443 = vmatpush1.bf16.msra.mxu0 %v3485_v43 }
  0x56   : > { %1444 = vmatprep.subr.bf16.mxu0 %v3490_v44  ;;  %876 = vmatmul.mubr.bf16.gmra.mrb[4].mxu1 %v499_v41  ;;  %v3575_v41 = vld [vmem:[%s4816_s5] ss:$16 sps:$4 sm:$0xff]   ;;  %v3580_v44 = vld [vmem:[%s4816_s5 + $0x24] ss:$16 sps:$4 sm:$0xff]  }
  0x57   : > { %885 = vmatprep.mubr.bf16.mxu1 %v3794_v0  ;;  %1983 = vmatpush1.bf16.msra.mxu1 %v3575_v41 }
  0x58   : > { %1984 = vmatprep.subr.bf16.mxu1 %v3580_v44 }
  0x59   : > { %1445 = vmatpush1.bf16.msra.mxu0 %v3488_v48 }
  0x5a   : > { %1446 = vmatprep.subr.bf16.mxu0 %v3493_v49  ;;  %v3578_v49 = vld [vmem:[%s4816_s5 + $0x20] ss:$16 sps:$4 sm:$0xff]  }
  0x5b   : > { %1985 = vmatpush1.bf16.msra.mxu1 %v3578_v49 }
  0x5c   : > { %773 = vmatmul.mubr.bf16.gmra.mrb[8].mxu0 %v500_v51 }
  0x5d   : > { %782 = vmatprep.mubr.bf16.mxu0 %v3794_v0  ;;  %1447 = vmatpush1.bf16.msra.mxu0 %v3491_v50 }
  0x5e   : > { %1448 = vmatprep.subr.bf16.mxu0 %v3496_v52  ;;  %886 = vmatmul.mubr.bf16.gmra.mrb[8].mxu1 %v500_v51  ;;  %v550_v51 = vsub.s32 2, %v4146_v28  ;;  %v3583_v52 = vld [vmem:[%s4816_s5 + $0x44] ss:$16 sps:$4 sm:$0xff]  }
  0x5f   : > { %895 = vmatprep.mubr.bf16.mxu1 %v3794_v0  ;;  %1986 = vmatprep.subr.bf16.mxu1 %v3583_v52 }
  0x61   : > { %1449 = vmatpush1.bf16.msra.mxu0 %v3494_v55  ;;  %v3527_v55 = vld [vmem:[%s4814_s3 + $0x100] ss:$8 sps:$4 sm:$0xff]  }
  0x62   : > { %1450 = vmatprep.subr.bf16.mxu0 %v3499_v56  ;;  %v554_v56 = vsub.s32 3, %v4146_v28 }
  0x64   : > { %783 = vmatmul.mubr.bf16.gmra.mrb[12].mxu0 %v501_v58 }
  0x65   : > { %792 = vmatprep.mubr.bf16.mxu0 %v3794_v0  ;;  %1451 = vmatpush1.bf16.msra.mxu0 %v3497_v57 }
  0x66   : > { %1452 = vmatprep.subr.bf16.mxu0 %v3502_v59  ;;  %896 = vmatmul.mubr.bf16.gmra.mrb[12].mxu1 %v501_v58  ;;  %v3532_v59 = vld [vmem:[%s4814_s3 + $0x114] ss:$8 sps:$4 sm:$0xff]  }
  0x67   : > { %905 = vmatprep.mubr.bf16.mxu1 %v3794_v0 }
  0x69   : > { %1453 = vmatpush1.bf16.msra.mxu0 %v3500_v62  ;;  %v3581_v62 = vld [vmem:[%s4816_s5 + $0x40] ss:$16 sps:$4 sm:$0xff]  }
  0x6a   : > { %1454 = vmatprep.subr.bf16.mxu0 %v3505_v63  ;;  %1987 = vmatpush1.bf16.msra.mxu1 %v3581_v62 }
  0x6c   : > { %793 = vmatmul.mubr.bf16.gmra.mrb[16].mxu0 %v502_v2 }
  0x6d   : > { %802 = vmatprep.mubr.bf16.mxu0 %v3794_v0  ;;  %1455 = vmatpush1.bf16.msra.mxu0 %v3503_v1 }
  0x6e   : > { %1456 = vmatprep.subr.bf16.mxu0 %v3508_v3  ;;  %906 = vmatmul.mubr.bf16.gmra.mrb[16].mxu1 %v502_v2  ;;  %v4198_v2 = vrot.slane %v538_v30, %v550_v51  ;;  %v3586_v3 = vld [vmem:[%s4816_s5 + $0x64] ss:$16 sps:$4 sm:$0xff]  }
  0x6f   : > { %915 = vmatprep.mubr.bf16.mxu1 %v3794_v0  ;;  %1988 = vmatprep.subr.bf16.mxu1 %v3586_v3  ;;  %v3544_v3 = vld [vmem:[%s4814_s3 + $0x154] ss:$8 sps:$4 sm:$0xff]  }
  0x71   : > { %1457 = vmatpush1.bf16.msra.mxu0 %v3506_v6  ;;  %v4209_v6 = vrot.slane %v538_v30, %v554_v56 }
  0x72   : > { %1458 = vmatprep.subr.bf16.mxu0 %v3511_v7 }
  0x74   : > { %803 = vmatmul.mubr.bf16.gmra.mrb[20].mxu0 %v503_v9 }
  0x75   : > { %812 = vmatprep.mubr.bf16.mxu0 %v3794_v0  ;;  %1459 = vmatpush1.bf16.msra.mxu0 %v3509_v8 }
  0x76   : > { %1460 = vmatprep.subr.bf16.mxu0 %v3514_v10  ;;  %916 = vmatmul.mubr.bf16.gmra.mrb[20].mxu1 %v503_v9  ;;  %v3535_v9 = vld [vmem:[%s4814_s3 + $0x124] ss:$8 sps:$4 sm:$0xff]  }
  0x77   : > { %925 = vmatprep.mubr.bf16.mxu1 %v3794_v0 }
  0x79   : > { %1461 = vmatpush1.bf16.msra.mxu0 %v3512_v13  ;;  %v3584_v13 = vld [vmem:[%s4816_s5 + $0x60] ss:$16 sps:$4 sm:$0xff]  }
  0x7a   : > { %1462 = vmatprep.subr.bf16.mxu0 %v3517_v14  ;;  %1989 = vmatpush1.bf16.msra.mxu1 %v3584_v13 }
  0x7c   : > { %813 = vmatmul.mubr.bf16.gmra.mrb[24].mxu0 %v504_v16 }
  0x7d   : > { %822 = vmatprep.mubr.bf16.mxu0 %v3794_v0  ;;  %1463 = vmatpush1.bf16.msra.mxu0 %v3515_v15 }
  0x7e   : > { %1464 = vmatprep.subr.bf16.mxu0 %v3520_v17  ;;  %926 = vmatmul.mubr.bf16.gmra.mrb[24].mxu1 %v504_v16  ;;  %v3589_v17 = vld [vmem:[%s4816_s5 + $0x84] ss:$16 sps:$4 sm:$0xff]  }
  0x7f   : > { %935 = vmatprep.mubr.bf16.mxu1 %v3794_v0  ;;  %1990 = vmatprep.subr.bf16.mxu1 %v3589_v17 }
  0x81   : > { %1465 = vmatpush1.bf16.msra.mxu0 %v3518_v20  ;;  %v3533_v20 = vld [vmem:[%s4814_s3 + $0x120] ss:$8 sps:$4 sm:$0xff]  }
  0x82   : > { %1466 = vmatprep.subr.bf16.mxu0 %v3523_v22 }
  0x84   : > { %823 = vmatmul.mubr.bf16.gmra.mrb[28].mxu0 %v505_v21 }
  0x85   : > { %1467 = vmatpush1.bf16.msra.mxu0 %v3521_v23 }
  0x86   : > { %936 = vmatmul.mubr.bf16.gmra.mrb[28].mxu1 %v505_v21  ;;  %1468 = vmatprep.subr.bf16.mxu0 %v3526_v24 }
  0x87   : > { %2014 = vmatprep.mubr.bf16.mxu1 %v3794_v0 }
  0x89   : > { %1469 = vmatpush1.bf16.msra.mxu0 %v3524_v25  ;;  %v3538_v25 = vld [vmem:[%s4814_s3 + $0x134] ss:$8 sps:$4 sm:$0xff]  }
  0x8a   : > { %1551 = vmatprep.subr.bf16.mxu0 %v3529_v26 }
 0x11f   : > { %v754_v34 = vpop.f32.mrb[0].mxu0 }
 0x120   : > { %v755_v35 = vadd.f32 %v754_v34, %v4158_v32  ;;  %v756_v36 = vpop.f32.mrb[1].mxu0 }
 0x121   : > { %v757_v37 = vadd.f32 %v756_v36, %v4161_v33  ;;  %v758_v38 = vpop.f32.mrb[2].mxu0  ;;  %v867_v12 = vpop.f32.mrb[0].mxu1 }
 0x122   : > { %v759_v39 = vadd.f32 %v758_v38, %v4158_v32  ;;  %v760_v40 = vpop.f32.mrb[3].mxu0  ;;  %v946_v45 = vmax.f32 %v755_v35, 0.0  ;;  %v868_v15 = vadd.f32 %v867_v12, %v4198_v2  ;;  %v869_v16 = vpop.f32.mrb[1].mxu1  ;;  %v3587_v38 = vld [vmem:[%s4816_s5 + $0x80] ss:$16 sps:$4 sm:$0xff]  }
 0x123   : > { %v761_v43 = vadd.f32 %v760_v40, %v4161_v33  ;;  %v947_v47 = vmax.f32 %v757_v37, 0.0  ;;  %v870_v21 = vadd.f32 %v869_v16, %v4209_v6  ;;  %v871_v22 = vpop.f32.mrb[2].mxu1  ;;  %1991 = vmatpush1.bf16.msra.mxu1 %v3587_v38  ;;  %v3542_v16 = vld [vmem:[%s4814_s3 + $0x150] ss:$8 sps:$4 sm:$0xff]  }
 0x124   : > { %v950_v46 = vmax.f32 %v759_v39, 0.0  ;;  %v948_v26 = vmax.f32 %v868_v15, 0.0  ;;  %v872_v27 = vadd.f32 %v871_v22, %v4198_v2  ;;  %v873_v30 = vpop.f32.mrb[3].mxu1 }
 0x125   : > { %v951_v48 = vmax.f32 %v761_v43, 0.0  ;;  %v949_v36 = vmax.f32 %v870_v21, 0.0  ;;  %v874_v37 = vadd.f32 %v873_v30, %v4209_v6  ;;  %v3536_v43 = vld [vmem:[%s4814_s3 + $0x130] ss:$8 sps:$4 sm:$0xff]  }
 0x126   : > { %v1010_v50 = vpack.c.bf16 %v950_v46, %v946_v45  ;;  %v952_v41 = vmax.f32 %v872_v27, 0.0 }
 0x127   : > { %v1011_v53 = vpack.c.bf16 %v951_v48, %v947_v47  ;;  %v764_v54 = vpop.f32.mrb[4].mxu0  ;;  %v953_v44 = vmax.f32 %v874_v37, 0.0  ;;  %v3541_v47 = vld [vmem:[%s4814_s3 + $0x144] ss:$8 sps:$4 sm:$0xff]  }
 0x128   : > { %v765_v57 = vadd.f32 %v764_v54, %v4158_v32  ;;  %v766_v58 = vpop.f32.mrb[5].mxu0  ;;  %v4243_v48 = vpack.c.bf16 %v952_v41, %v948_v26  ;;  %v3550_v41 = vld [vmem:[%s4814_s3 + $0x174] ss:$8 sps:$4 sm:$0xff]  }
 0x129   : > { %v767_v60 = vadd.f32 %v766_v58, %v4161_v33  ;;  %v768_v61 = vpop.f32.mrb[6].mxu0  ;;  %1470 = vmatprep.mubr.bf16.mxu0 %v1011_v53  ;;  %v4245_v52 = vpack.c.bf16 %v953_v44, %v949_v36  ;;  %v877_v53 = vpop.f32.mrb[4].mxu1  ;;  %v3545_v36 = vld [vmem:[%s4814_s3 + $0x160] ss:$8 sps:$4 sm:$0xff]  }
 0x12a   : > { %v769_v63 = vadd.f32 %v768_v61, %v4158_v32  ;;  %v770_v1 = vpop.f32.mrb[7].mxu0  ;;  %1471 = vmatmul.mubr.bf16.vlgmr.msra.gmra.mrb[32].mxu0 %v1010_v50  ;;  %v954_v7 = vmax.f32 %v765_v57, 0.0  ;;  %v879_v57 = vpop.f32.mrb[5].mxu1 }
 0x12b   : > { %v771_v4 = vadd.f32 %v770_v1, %v4161_v33  ;;  %1552 = vmatpush1.bf16.msra.mxu0 %v3527_v55  ;;  %v955_v10 = vmax.f32 %v767_v60, 0.0  ;;  %v878_v55 = vadd.f32 %v877_v53, %v4198_v2  ;;  %v3539_v60 = vld [vmem:[%s4814_s3 + $0x140] ss:$8 sps:$4 sm:$0xff]   ;;  %v880_v61 = vadd.f32 %v879_v57, %v4209_v6  ;;  %v881_v62 = vpop.f32.mrb[6].mxu1  ;;  %v3548_v57 = vld [vmem:[%s4814_s3 + $0x170] ss:$8 sps:$4 sm:$0xff]  }
 0x12c   : > { %v958_v8 = vmax.f32 %v769_v63, 0.0  ;;  %1553 = vmatprep.subr.bf16.mxu0 %v3532_v59 }
 0x12d   : > { %v959_v11 = vmax.f32 %v771_v4, 0.0  ;;  %v956_v4 = vmax.f32 %v878_v55, 0.0 }
 0x12e   : > { %v1014_v14 = vpack.c.bf16 %v958_v8, %v954_v7  ;;  %v883_v7 = vpop.f32.mrb[7].mxu1 }
 0x12f   : > { %v1015_v18 = vpack.c.bf16 %v959_v11, %v955_v10  ;;  %1554 = vmatpush1.bf16.msra.mxu0 %v3530_v5  ;;  %v774_v19 = vpop.f32.mrb[8].mxu0  ;;  %v882_v5 = vadd.f32 %v881_v62, %v4198_v2  ;;  %v957_v10 = vmax.f32 %v880_v61, 0.0  ;;  %v884_v11 = vadd.f32 %v883_v7, %v4209_v6  ;;  %v3553_v61 = vld [vmem:[%s4814_s3 + $0x184] ss:$8 sps:$4 sm:$0xff]  }
 0x130   : > { %v775_v23 = vadd.f32 %v774_v19, %v4158_v32  ;;  %v776_v24 = vpop.f32.mrb[9].mxu0  ;;  %1555 = vmatprep.subr.bf16.mxu0 %v3535_v9 }
 0x131   : > { %v777_v34 = vadd.f32 %v776_v24, %v4161_v33  ;;  %v778_v35 = vpop.f32.mrb[10].mxu0  ;;  %1480 = vmatprep.mubr.bf16.mxu0 %v1015_v18  ;;  %v961_v17 = vmax.f32 %v884_v11, 0.0  ;;  %v3551_v11 = vld [vmem:[%s4814_s3 + $0x180] ss:$8 sps:$4 sm:$0xff]  }
 0x132   : > { %v779_v39 = vadd.f32 %v778_v35, %v4158_v32  ;;  %v780_v40 = vpop.f32.mrb[11].mxu0  ;;  %1481 = vmatmul.mubr.bf16.gmra.mrb[36].mxu0 %v1014_v14  ;;  %v962_v45 = vmax.f32 %v775_v23, 0.0  ;;  %v960_v14 = vmax.f32 %v882_v5, 0.0 }
 0x133   : > { %v781_v42 = vadd.f32 %v780_v40, %v4161_v33  ;;  %1556 = vmatpush1.bf16.msra.mxu0 %v3533_v20  ;;  %v963_v49 = vmax.f32 %v777_v34, 0.0  ;;  %v3547_v20 = vld [vmem:[%s4814_s3 + $0x164] ss:$8 sps:$4 sm:$0xff]   ;;  %v4269_v24 = vpack.c.bf16 %v961_v17, %v957_v10 }
 0x134   : > { %v966_v46 = vmax.f32 %v779_v39, 0.0  ;;  %1557 = vmatprep.subr.bf16.mxu0 %v3538_v25  ;;  %v4267_v21 = vpack.c.bf16 %v960_v14, %v956_v4  ;;  %v887_v25 = vpop.f32.mrb[8].mxu1 }
 0x135   : > { %v967_v50 = vmax.f32 %v781_v42, 0.0  ;;  %v888_v27 = vadd.f32 %v887_v25, %v4198_v2  ;;  %v889_v30 = vpop.f32.mrb[9].mxu1 }
 0x136   : > { %v1018_v54 = vpack.c.bf16 %v966_v46, %v962_v45  ;;  %v890_v37 = vadd.f32 %v889_v30, %v4209_v6  ;;  %v891_v38 = vpop.f32.mrb[10].mxu1 }
 0x137   : > { %v1019_v58 = vpack.c.bf16 %v967_v50, %v963_v49  ;;  %1558 = vmatpush1.bf16.msra.mxu0 %v3536_v43  ;;  %v784_v59 = vpop.f32.mrb[12].mxu0  ;;  %v964_v42 = vmax.f32 %v888_v27, 0.0  ;;  %v892_v43 = vadd.f32 %v891_v38, %v4198_v2  ;;  %v893_v44 = vpop.f32.mrb[11].mxu1 }
 0x138   : > { %v785_v63 = vadd.f32 %v784_v59, %v4158_v32  ;;  %v786_v1 = vpop.f32.mrb[13].mxu0  ;;  %1559 = vmatprep.subr.bf16.mxu0 %v3541_v47  ;;  %v965_v47 = vmax.f32 %v890_v37, 0.0  ;;  %v894_v49 = vadd.f32 %v893_v44, %v4209_v6 }
 0x139   : > { %v787_v8 = vadd.f32 %v786_v1, %v4161_v33  ;;  %v788_v9 = vpop.f32.mrb[14].mxu0  ;;  %1490 = vmatprep.mubr.bf16.mxu0 %v1019_v58  ;;  %v897_v4 = vpop.f32.mrb[12].mxu1 }
 0x13a   : > { %v789_v12 = vadd.f32 %v788_v9, %v4158_v32  ;;  %v790_v13 = vpop.f32.mrb[15].mxu0  ;;  %1491 = vmatmul.mubr.bf16.gmra.mrb[40].mxu0 %v1018_v54  ;;  %v970_v18 = vmax.f32 %v785_v63, 0.0  ;;  %v968_v54 = vmax.f32 %v892_v43, 0.0  ;;  %v969_v58 = vmax.f32 %v894_v49, 0.0 }
 0x13b   : > { %v791_v15 = vadd.f32 %v790_v13, %v4161_v33  ;;  %1560 = vmatpush1.bf16.msra.mxu0 %v3539_v60  ;;  %v971_v22 = vmax.f32 %v787_v8, 0.0  ;;  %v898_v7 = vadd.f32 %v897_v4, %v4198_v2  ;;  %v899_v8 = vpop.f32.mrb[13].mxu1 }
 0x13c   : > { %v974_v19 = vmax.f32 %v789_v12, 0.0  ;;  %1561 = vmatprep.subr.bf16.mxu0 %v3544_v3  ;;  %v4291_v62 = vpack.c.bf16 %v968_v54, %v964_v42  ;;  %v4293_v3 = vpack.c.bf16 %v969_v58, %v965_v47  ;;  %v900_v12 = vadd.f32 %v899_v8, %v4209_v6  ;;  %v901_v13 = vpop.f32.mrb[14].mxu1 }
 0x13d   : > { %v975_v23 = vmax.f32 %v791_v15, 0.0  ;;  %v972_v17 = vmax.f32 %v898_v7, 0.0 }
 0x13e   : > { %v1022_v26 = vpack.c.bf16 %v974_v19, %v970_v18  ;;  %v902_v18 = vadd.f32 %v901_v13, %v4198_v2  ;;  %v903_v19 = vpop.f32.mrb[15].mxu1 }
 0x13f   : > { %v1023_v34 = vpack.c.bf16 %v975_v23, %v971_v22  ;;  %1562 = vmatpush1.bf16.msra.mxu0 %v3542_v16  ;;  %v794_v35 = vpop.f32.mrb[16].mxu0  ;;  %v3556_v16 = vld [vmem:[%s4814_s3 + $0x194] ss:$8 sps:$4 sm:$0xff]   ;;  %v973_v23 = vmax.f32 %v900_v12, 0.0  ;;  %v904_v25 = vadd.f32 %v903_v19, %v4209_v6  ;;  %v3560_v12 = vld [vmem:[%s4814_s3 + $0x1b0] ss:$8 sps:$4 sm:$0xff]  }
 0x140   : > { %v795_v39 = vadd.f32 %v794_v35, %v4158_v32  ;;  %v796_v40 = vpop.f32.mrb[17].mxu0  ;;  %1563 = vmatprep.subr.bf16.mxu0 %v3547_v20  ;;  %v976_v30 = vmax.f32 %v902_v18, 0.0  ;;  %v3554_v35 = vld [vmem:[%s4814_s3 + $0x190] ss:$8 sps:$4 sm:$0xff]  }
 0x141   : > { %v797_v45 = vadd.f32 %v796_v40, %v4161_v33  ;;  %v798_v46 = vpop.f32.mrb[18].mxu0  ;;  %1500 = vmatprep.mubr.bf16.mxu0 %v1023_v34  ;;  %v907_v44 = vpop.f32.mrb[16].mxu1 }
 0x142   : > { %v799_v50 = vadd.f32 %v798_v46, %v4158_v32  ;;  %v800_v53 = vpop.f32.mrb[19].mxu0  ;;  %1501 = vmatmul.mubr.bf16.gmra.mrb[44].mxu0 %v1022_v26  ;;  %v978_v59 = vmax.f32 %v795_v39, 0.0  ;;  %v3559_v39 = vld [vmem:[%s4814_s3 + $0x1a4] ss:$8 sps:$4 sm:$0xff]   ;;  %v4315_v40 = vpack.c.bf16 %v976_v30, %v972_v17  ;;  %v908_v46 = vadd.f32 %v907_v44, %v4198_v2  ;;  %v909_v47 = vpop.f32.mrb[17].mxu1 }
 0x143   : > { %v801_v55 = vadd.f32 %v800_v53, %v4161_v33  ;;  %1564 = vmatpush1.bf16.msra.mxu0 %v3545_v36  ;;  %v979_v63 = vmax.f32 %v797_v45, 0.0  ;;  %v977_v36 = vmax.f32 %v904_v25, 0.0  ;;  %v3557_v53 = vld [vmem:[%s4814_s3 + $0x1a0] ss:$8 sps:$4 sm:$0xff]   ;;  %v910_v54 = vadd.f32 %v909_v47, %v4209_v6 }
 0x144   : > { %v982_v60 = vmax.f32 %v799_v50, 0.0  ;;  %1565 = vmatprep.subr.bf16.mxu0 %v3550_v41 }
 0x145   : > { %v983_v1 = vmax.f32 %v801_v55, 0.0  ;;  %v4317_v43 = vpack.c.bf16 %v977_v36, %v973_v23  ;;  %v911_v55 = vpop.f32.mrb[18].mxu1 }
 0x146   : > { %v1026_v5 = vpack.c.bf16 %v982_v60, %v978_v59  ;;  %v3562_v59 = vld [vmem:[%s4814_s3 + $0x1b4] ss:$8 sps:$4 sm:$0xff]   ;;  %v980_v60 = vmax.f32 %v908_v46, 0.0 }
 0x147   : > { %v1027_v9 = vpack.c.bf16 %v983_v1, %v979_v63  ;;  %1566 = vmatpush1.bf16.msra.mxu0 %v3548_v57  ;;  %v804_v10 = vpop.f32.mrb[20].mxu0  ;;  %v913_v63 = vpop.f32.mrb[19].mxu1 }
 0x148   : > { %v805_v14 = vadd.f32 %v804_v10, %v4158_v32  ;;  %v806_v15 = vpop.f32.mrb[21].mxu0  ;;  %1567 = vmatprep.subr.bf16.mxu0 %v3553_v61  ;;  %v912_v61 = vadd.f32 %v911_v55, %v4198_v2  ;;  %v914_v7 = vadd.f32 %v913_v63, %v4209_v6 }
 0x149   : > { %v807_v20 = vadd.f32 %v806_v15, %v4161_v33  ;;  %v808_v22 = vpop.f32.mrb[22].mxu0  ;;  %1510 = vmatprep.mubr.bf16.mxu0 %v1027_v9 }
 0x14a   : > { %v809_v26 = vadd.f32 %v808_v22, %v4158_v32  ;;  %v810_v27 = vpop.f32.mrb[23].mxu0  ;;  %1511 = vmatmul.mubr.bf16.gmra.mrb[48].mxu0 %v1026_v5  ;;  %v986_v37 = vmax.f32 %v805_v14, 0.0  ;;  %v981_v5 = vmax.f32 %v910_v54, 0.0  ;;  %v984_v10 = vmax.f32 %v912_v61, 0.0  ;;  %v917_v22 = vpop.f32.mrb[20].mxu1 }
 0x14b   : > { %v811_v34 = vadd.f32 %v810_v27, %v4161_v33  ;;  %1568 = vmatpush1.bf16.msra.mxu0 %v3551_v11  ;;  %v987_v41 = vmax.f32 %v807_v20, 0.0  ;;  %v985_v13 = vmax.f32 %v914_v7, 0.0  ;;  %v918_v25 = vadd.f32 %v917_v22, %v4198_v2  ;;  %v3571_v61 = vld [vmem:[%s4814_s3 + $0x1e4] ss:$8 sps:$4 sm:$0xff]  }
 0x14c   : > { %v990_v38 = vmax.f32 %v809_v26, 0.0  ;;  %1569 = vmatprep.subr.bf16.mxu0 %v3556_v16  ;;  %v3565_v16 = vld [vmem:[%s4814_s3 + $0x1c4] ss:$8 sps:$4 sm:$0xff]   ;;  %v4339_v17 = vpack.c.bf16 %v984_v10, %v980_v60  ;;  %v919_v26 = vpop.f32.mrb[21].mxu1  ;;  %v3569_v10 = vld [vmem:[%s4814_s3 + $0x1e0] ss:$8 sps:$4 sm:$0xff]  }
 0x14d   : > { %v991_v42 = vmax.f32 %v811_v34, 0.0  ;;  %v4341_v20 = vpack.c.bf16 %v985_v13, %v981_v5  ;;  %v3563_v34 = vld [vmem:[%s4814_s3 + $0x1c0] ss:$8 sps:$4 sm:$0xff]   ;;  %v921_v36 = vpop.f32.mrb[22].mxu1  ;;  %v3574_v13 = vld [vmem:[%s4814_s3 + $0x1f4] ss:$8 sps:$4 sm:$0xff]  }
 0x14e   : > { %v1030_v45 = vpack.c.bf16 %v990_v38, %v986_v37  ;;  %v923_v44 = vpop.f32.mrb[23].mxu1 }
 0x14f   : > { %v1031_v49 = vpack.c.bf16 %v991_v42, %v987_v41  ;;  %1570 = vmatpush1.bf16.msra.mxu0 %v3554_v35  ;;  %v814_v50 = vpop.f32.mrb[24].mxu0  ;;  %v920_v35 = vadd.f32 %v919_v26, %v4209_v6  ;;  %v988_v41 = vmax.f32 %v918_v25, 0.0  ;;  %v922_v42 = vadd.f32 %v921_v36, %v4198_v2 }
 0x150   : > { %v815_v57 = vadd.f32 %v814_v50, %v4158_v32  ;;  %v816_v58 = vpop.f32.mrb[25].mxu0  ;;  %1571 = vmatprep.subr.bf16.mxu0 %v3559_v39  ;;  %v3568_v39 = vld [vmem:[%s4814_s3 + $0x1d4] ss:$8 sps:$4 sm:$0xff]  }
 0x151   : > { %v817_v1 = vadd.f32 %v816_v58, %v4161_v33  ;;  %v818_v4 = vpop.f32.mrb[26].mxu0  ;;  %1520 = vmatprep.mubr.bf16.mxu0 %v1031_v49  ;;  %v989_v47 = vmax.f32 %v920_v35, 0.0  ;;  %v924_v49 = vadd.f32 %v923_v44, %v4209_v6  ;;  %v992_v54 = vmax.f32 %v922_v42, 0.0  ;;  %v927_v5 = vpop.f32.mrb[24].mxu1 }
 0x152   : > { %v819_v8 = vadd.f32 %v818_v4, %v4158_v32  ;;  %v820_v9 = vpop.f32.mrb[27].mxu0  ;;  %1521 = vmatmul.mubr.bf16.gmra.mrb[52].mxu0 %v1030_v45  ;;  %v994_v14 = vmax.f32 %v815_v57, 0.0  ;;  %v3566_v57 = vld [vmem:[%s4814_s3 + $0x1d0] ss:$8 sps:$4 sm:$0xff]  }
 0x153   : > { %v821_v11 = vadd.f32 %v820_v9, %v4161_v33  ;;  %1572 = vmatpush1.bf16.msra.mxu0 %v3557_v53  ;;  %v995_v18 = vmax.f32 %v817_v1, 0.0  ;;  %v993_v58 = vmax.f32 %v924_v49, 0.0  ;;  %v1032_v63 = vpack.c.bf16 %v992_v54, %v988_v41 }
 0x154   : > { %v998_v15 = vmax.f32 %v819_v8, 0.0  ;;  %1573 = vmatprep.subr.bf16.mxu0 %v3562_v59  ;;  %v929_v8 = vpop.f32.mrb[25].mxu1 }
 0x155   : > { %v999_v19 = vmax.f32 %v821_v11, 0.0  ;;  %v1033_v4 = vpack.c.bf16 %v993_v58, %v989_v47  ;;  %v930_v11 = vadd.f32 %v929_v8, %v4209_v6 }
 0x156   : > { %v1034_v23 = vpack.c.bf16 %v998_v15, %v994_v14 }
 0x157   : > { %v1035_v27 = vpack.c.bf16 %v999_v19, %v995_v18  ;;  %1574 = vmatpush1.bf16.msra.mxu0 %v3560_v12  ;;  %v824_v30 = vpop.f32.mrb[28].mxu0  ;;  %v931_v12 = vpop.f32.mrb[26].mxu1  ;;  %v997_v18 = vmax.f32 %v930_v11, 0.0 }
 0x158   : > { %v825_v37 = vadd.f32 %v824_v30, %v4158_v32  ;;  %v826_v38 = vpop.f32.mrb[29].mxu0  ;;  %1575 = vmatprep.subr.bf16.mxu0 %v3565_v16  ;;  %v932_v15 = vadd.f32 %v931_v12, %v4198_v2  ;;  %v933_v16 = vpop.f32.mrb[27].mxu1 }
 0x159   : > { %v827_v45 = vadd.f32 %v826_v38, %v4161_v33  ;;  %v828_v46 = vpop.f32.mrb[30].mxu0  ;;  %1530 = vmatprep.mubr.bf16.mxu0 %v1035_v27  ;;  %v934_v19 = vadd.f32 %v933_v16, %v4209_v6  ;;  %v937_v30 = vpop.f32.mrb[28].mxu1 }
 0x15a   : > { %v829_v50 = vadd.f32 %v828_v46, %v4158_v32  ;;  %v830_v53 = vpop.f32.mrb[31].mxu0  ;;  %1531 = vmatmul.mubr.bf16.gmra.mrb[56].mxu0 %v1034_v23  ;;  %v1002_v59 = vmax.f32 %v825_v37, 0.0  ;;  %v1000_v22 = vmax.f32 %v932_v15, 0.0  ;;  %v3572_v23 = vld [vmem:[%s4814_s3 + $0x1f0] ss:$8 sps:$4 sm:$0xff]   ;;  %v939_v35 = vpop.f32.mrb[29].mxu1 }
 0x15b   : > { %v831_v55 = vadd.f32 %v830_v53, %v4161_v33  ;;  %1576 = vmatpush1.bf16.msra.mxu0 %v3563_v34  ;;  %v1003_v32 = vmax.f32 %v827_v45, 0.0  ;;  %v928_v33 = vadd.f32 %v927_v5, %v4198_v2  ;;  %v1001_v25 = vmax.f32 %v934_v19, 0.0  ;;  %v941_v37 = vpop.f32.mrb[30].mxu1 }
 0x15c   : > { %v1006_v60 = vmax.f32 %v829_v50, 0.0  ;;  %1577 = vmatprep.subr.bf16.mxu0 %v3568_v39  ;;  %v938_v34 = vadd.f32 %v937_v30, %v4198_v2  ;;  %v940_v36 = vadd.f32 %v939_v35, %v4209_v6  ;;  %v942_v39 = vadd.f32 %v941_v37, %v4198_v2  ;;  %v943_v41 = vpop.f32.mrb[31].mxu1  ;;  %v3592_v2 = vld [vmem:[%s4816_s5 + $0xa4] ss:$16 sps:$4 sm:$0xff]  }
 0x15d   : > { %v1007_v1 = vmax.f32 %v831_v55, 0.0  ;;  %v996_v14 = vmax.f32 %v928_v33, 0.0  ;;  %v1037_v27 = vpack.c.bf16 %v1001_v25, %v997_v18  ;;  %v944_v44 = vadd.f32 %v943_v41, %v4209_v6  ;;  %v3590_v6 = vld [vmem:[%s4816_s5 + $0xa0] ss:$16 sps:$4 sm:$0xff]   ;;  %1992 = vmatprep.subr.bf16.mxu1 %v3592_v2 }
 0x15e   : > { %v1038_v7 = vpack.c.bf16 %v1006_v60, %v1002_v59  ;;  %v1004_v38 = vmax.f32 %v938_v34, 0.0  ;;  %v1005_v42 = vmax.f32 %v940_v36, 0.0  ;;  %1993 = vmatpush1.bf16.msra.mxu1 %v3590_v6  ;;  %v3623_v34 = vld [vmem:[#allocation2 + $0x40] sm:$0xff]   ;;  %v3625_v36 = vld [vmem:[#allocation2 + $0x48] sm:$0xff]  }
 0x15f   : > { %v1039_v9 = vpack.c.bf16 %v1007_v1, %v1003_v32  ;;  %1578 = vmatpush1.bf16.msra.mxu0 %v3566_v57  ;;  %v1036_v26 = vpack.c.bf16 %v1000_v22, %v996_v14  ;;  %v1009_v45 = vmax.f32 %v944_v44, 0.0  ;;  %v1713_v22 = vld [vmem:[%s4455_s22 + $0x8] sm:$0xff]  ;;  %v3624_v35 = vld [vmem:[#allocation2] sm:$0xff]  }
 0x160   : > { %1579 = vmatprep.subr.bf16.mxu0 %v3571_v61 }
 0x161   : > { %1540 = vmatprep.mubr.bf16.mxu0 %v1039_v9  ;;  %v1041_v47 = vpack.c.bf16 %v1009_v45, %v1005_v42  ;;  %v3626_v45 = vld [vmem:[#allocation2 + $0x8] sm:$0xff]  }
 0x162   : > { %1541 = vmatmul.mubr.bf16.gmra.mrb[60].mxu0 %v1038_v7 }
 0x163   : > { %1580 = vmatpush1.bf16.msra.mxu0 %v3569_v10  ;;  %1583 = vmatprep.mubr.bf16.mxu0 %v4245_v52  ;;  %v1008_v52 = vmax.f32 %v942_v39, 0.0 }
 0x164   : > { %1581 = vmatprep.subr.bf16.mxu0 %v3574_v13  ;;  %v1712_v13 = vld [vmem:[%s4455_s22] sm:$0xff] }
 0x165   : > { %v1040_v46 = vpack.c.bf16 %v1008_v52, %v1004_v38 }
 0x167   : > { %1582 = vmatpush1.bf16.msra.mxu0 %v3572_v23 }
 0x168   : > { %3217 = vmatprep.subr.bf16.mxu0 %v3623_v34  ;;  %v3632_v34 = vld [vmem:[#allocation2 + $0x20] sm:$0xff]  }
 0x16a   : > { %1584 = vmatmul.mubr.bf16.vlgmr.msra.gmra.mrb[32].mxu0 %v4243_v48  ;;  %v3595_v48 = vld [vmem:[%s4816_s5 + $0xc4] ss:$16 sps:$4 sm:$0xff]  }
 0x16b   : > { %1593 = vmatprep.mubr.bf16.mxu0 %v4269_v24  ;;  %1994 = vmatprep.subr.bf16.mxu1 %v3595_v48  ;;  %v3598_v24 = vld [vmem:[%s4816_s5 + $0xe4] ss:$16 sps:$4 sm:$0xff]   ;;  %v3599_v48 = vld [vmem:[%s4816_s5 + $0x8] ss:$16 sps:$4 sm:$0xff]  }
 0x16c   : > { %3218 = vmatpush3.bf16.msra.mxu0 %v3624_v35 }
 0x16d   : > { %3219 = vmatprep.subr.bf16.mxu0 %v3625_v36 }
 0x170   : > { %3220 = vmatpush3.bf16.msra.mxu0 %v3626_v45 }
 0x172   : > { %1594 = vmatmul.mubr.bf16.gmra.mrb[36].mxu0 %v4267_v21  ;;  %v3593_v21 = vld [vmem:[%s4816_s5 + $0xc0] ss:$16 sps:$4 sm:$0xff]  }
 0x173   : > { %1603 = vmatprep.mubr.bf16.mxu0 %v4293_v3  ;;  %1995 = vmatpush1.bf16.msra.mxu1 %v3593_v21  ;;  %v3601_v3 = vld [vmem:[%s4816_s5 + $0xc] ss:$16 sps:$4 sm:$0xff]   ;;  %v1714_v21 = vld [vmem:[%s4455_s22 + $0x10] sm:$0xff] }
 0x174   : > { %1996 = vmatprep.subr.bf16.mxu1 %v3598_v24 }
 0x17a   : > { %1604 = vmatmul.mubr.bf16.gmra.mrb[40].mxu0 %v4291_v62  ;;  %v3596_v62 = vld [vmem:[%s4816_s5 + $0xe0] ss:$16 sps:$4 sm:$0xff]  }
 0x17b   : > { %1613 = vmatprep.mubr.bf16.mxu0 %v4317_v43  ;;  %1997 = vmatpush1.bf16.msra.mxu1 %v3596_v62 }
 0x17c   : > { %2095 = vmatprep.subr.bf16.mxu1 %v3601_v3 }
 0x182   : > { %1614 = vmatmul.mubr.bf16.gmra.mrb[44].mxu0 %v4315_v40  ;;  %v1106_v40 = vld [vmem:[%s4815_s4] sm:$0x3] }
 0x183   : > { %1623 = vmatprep.mubr.bf16.mxu0 %v4341_v20  ;;  %v4415_v43 = vrot.slane %v1106_v40, %v4149_v29 }
 0x18a   : > { %1624 = vmatmul.mubr.bf16.gmra.mrb[48].mxu0 %v4339_v17  ;;  %v4418_v17 = vrot.slane %v1106_v40, %v4155_v31  ;;  %v3604_v40 = vld [vmem:[%s4816_s5 + $0x2c] ss:$16 sps:$4 sm:$0xff]  }
 0x18b   : > { %1633 = vmatprep.mubr.bf16.mxu0 %v1033_v4 }
 0x192   : > { %1634 = vmatmul.mubr.bf16.gmra.mrb[52].mxu0 %v1032_v63 }
 0x193   : > { %1643 = vmatprep.mubr.bf16.mxu0 %v1037_v27 }
 0x19a   : > { %1644 = vmatmul.mubr.bf16.gmra.mrb[56].mxu0 %v1036_v26 }
 0x19b   : > { %1653 = vmatprep.mubr.bf16.mxu0 %v1041_v47  ;;  %v3627_v47 = vld [vmem:[#allocation2 + $0x50] sm:$0xff]  }
 0x19c   : > { %3221 = vmatprep.subr.bf16.mxu0 %v3627_v47 }
 0x1a2   : > { %1654 = vmatmul.mubr.bf16.gmra.mrb[60].mxu0 %v1040_v46 }
 0x23d   : > { %v1585_v20 = vpop.f32.mrb[32].mxu0 }
 0x23e   : > { %v3345_v49 = vadd.f32 %v1585_v20, %v4415_v43  ;;  %v1587_v50 = vpop.f32.mrb[33].mxu0 }
 0x23f   : > { %v3346_v53 = vadd.f32 %v1587_v50, %v4418_v17  ;;  %v1589_v54 = vpop.f32.mrb[34].mxu0 }
 0x240   : > { %2857 = vst [vmem:[%s4424_s23] sm:$0xff] %v3345_v49  ;;  %v3347_v55 = vadd.f32 %v1589_v54, %v4415_v43  ;;  %v1591_v57 = vpop.f32.mrb[35].mxu0  ;;  %v3628_v54 = vld [vmem:[#allocation2 + $0x10] sm:$0xff]  }
 0x241   : > { %v1664_v58 = vmul.f32 0.5, %v3346_v53  ;;  %2873 = vst [vmem:[%s4431_s29] sm:$0xff] %v3346_v53  ;;  %v3348_v59 = vadd.f32 %v1591_v57, %v4418_v17  ;;  %v1715_v53 = vld [vmem:[%s4455_s22 + $0x18] sm:$0xff]  ;;  %3222 = vmatpush3.bf16.msra.mxu0 %v3628_v54 }
 0x242   : > { %2858 = vst [vmem:[%s4424_s23 + $0x8] sm:$0xff] %v3347_v55 }
 0x243   : > { %v1680_v60 = vmul.f32 1.442695, %v1664_v58  ;;  %v1665_v61 = vmul.f32 0.5, %v3348_v59  ;;  %2874 = vst [vmem:[%s4431_s29 + $0x8] sm:$0xff] %v3348_v59  ;;  %v3629_v59 = vld [vmem:[#allocation2 + $0x58] sm:$0xff]  }
 0x244   : > { %3223 = vmatprep.subr.bf16.mxu0 %v3629_v59 }
 0x245   : > { %3655 = vpow2.f32 %v1680_v60  ;;  %v1682_v63 = vmul.f32 1.442695, %v1665_v61  ;;  %v1595_v32 = vpop.f32.mrb[36].mxu0 }
 0x246   : > { %v4441_v1 = vadd.f32 %v1595_v32, %v4415_v43  ;;  %v1597_v4 = vpop.f32.mrb[37].mxu0  ;;  %v3602_v32 = vld [vmem:[%s4816_s5 + $0x28] ss:$16 sps:$4 sm:$0xff]  }
 0x247   : > { %3657 = vpow2.f32 %v1682_v63  ;;  %v3350_v5 = vadd.f32 %v1597_v4, %v4418_v17  ;;  %v1599_v7 = vpop.f32.mrb[38].mxu0 }
 0x248   : > { %2859 = vst [vmem:[%s4424_s23 + $0x10] sm:$0xff] %v4441_v1  ;;  %v4447_v33 = vadd.f32 %v1599_v7, %v4415_v43  ;;  %v1601_v8 = vpop.f32.mrb[39].mxu0  ;;  %v3607_v7 = vld [vmem:[%s4816_s5 + $0x4c] ss:$16 sps:$4 sm:$0xff]  }
 0x249   : > { %v1666_v9 = vmul.f32 0.5, %v3350_v5  ;;  %2875 = vst [vmem:[%s4431_s29 + $0x10] sm:$0xff] %v3350_v5  ;;  %v3352_v10 = vadd.f32 %v1601_v8, %v4418_v17 }
 0x24a   : > { %2860 = vst [vmem:[%s4424_s23 + $0x18] sm:$0xff] %v4447_v33 }
 0x24b   : > { %v1684_v11 = vmul.f32 1.442695, %v1666_v9  ;;  %v1667_v12 = vmul.f32 0.5, %v3352_v10  ;;  %2876 = vst [vmem:[%s4431_s29 + $0x18] sm:$0xff] %v3352_v10  ;;  %v3630_v10 = vld [vmem:[#allocation2 + $0x18] sm:$0xff]  }
 0x24c   : > { %3224 = vmatpush3.bf16.msra.mxu0 %v3630_v10 }
 0x24d   : > { %3659 = vpow2.f32 %v1684_v11  ;;  %v1686_v14 = vmul.f32 1.442695, %v1667_v12  ;;  %v1605_v15 = vpop.f32.mrb[40].mxu0  ;;  %v3631_v12 = vld [vmem:[#allocation2 + $0x60] sm:$0xff]  }
 0x24e   : > { %v4462_v16 = vadd.f32 %v1605_v15, %v4415_v43  ;;  %v1607_v18 = vpop.f32.mrb[41].mxu0  ;;  %v1716_v15 = vld [vmem:[%s4455_s22 + $0x20] sm:$0xff]  ;;  %3225 = vmatprep.subr.bf16.mxu0 %v3631_v12 }
 0x24f   : > { %v3656_v19 = vpop.eup %3655  ;;  %3661 = vpow2.f32 %v1686_v14  ;;  %v3354_v23 = vadd.f32 %v1607_v18, %v4418_v17  ;;  %v1609_v25 = vpop.f32.mrb[42].mxu0 }
 0x250   : > { %v1728_v26 = vmul.f32 %v3656_v19, %v1712_v13  ;;  %2861 = vst [vmem:[%s4424_s23 + $0x20] sm:$0xff] %v4462_v16  ;;  %v4469_v27 = vadd.f32 %v1609_v25, %v4415_v43  ;;  %v1611_v30 = vpop.f32.mrb[43].mxu0  ;;  %3226 = vmatpush3.bf16.msra.mxu0 %v3632_v34 }
 0x251   : > { %v3658_v37 = vpop.eup %3657  ;;  %v1668_v38 = vmul.f32 0.5, %v3354_v23  ;;  %2877 = vst [vmem:[%s4431_s29 + $0x20] sm:$0xff] %v3354_v23  ;;  %v3356_v39 = vadd.f32 %v1611_v30, %v4418_v17  ;;  %v1717_v30 = vld [vmem:[%s4455_s22 + $0x28] sm:$0xff] }
 0x252   : > { %v1729_v41 = vmul.f32 %v3658_v37, %v1713_v22  ;;  %2862 = vst [vmem:[%s4424_s23 + $0x28] sm:$0xff] %v4469_v27  ;;  %v1744_v42 = vadd.f32 %v3345_v49, %v1728_v26 }
 0x253   : > { %v1688_v44 = vmul.f32 1.442695, %v1668_v38  ;;  %v1669_v52 = vmul.f32 0.5, %v3356_v39  ;;  %2878 = vst [vmem:[%s4431_s29 + $0x28] sm:$0xff] %v3356_v39  ;;  %v3633_v38 = vld [vmem:[#allocation2 + $0x68] sm:$0xff]  }
 0x254   : > { %v1745_v46 = vadd.f32 %v3347_v55, %v1729_v41  ;;  %3227 = vmatprep.subr.bf16.mxu0 %v3633_v38 }
 0x255   : > { %3663 = vpow2.f32 %v1688_v44  ;;  %v1690_v2 = vmul.f32 1.442695, %v1669_v52  ;;  %v1615_v6 = vpop.f32.mrb[44].mxu0  ;;  %v3608_v44 = vld [vmem:[%s4816_s5 + $0x68] ss:$16 sps:$4 sm:$0xff]  }
 0x256   : > { %v4481_v24 = vadd.f32 %v1615_v6, %v4415_v43  ;;  %v1617_v62 = vpop.f32.mrb[45].mxu0  ;;  %v4483_v3 = vpack.c.bf16 %v1745_v46, %v1744_v42  ;;  %v3613_v46 = vld [vmem:[%s4816_s5 + $0x8c] ss:$16 sps:$4 sm:$0xff]  }
 0x257   : > { %v3660_v20 = vpop.eup %3659  ;;  %3665 = vpow2.f32 %v1690_v2  ;;  %v3358_v49 = vadd.f32 %v1617_v62, %v4418_v17  ;;  %v1619_v50 = vpop.f32.mrb[46].mxu0  ;;  %v1718_v62 = vld [vmem:[%s4455_s22 + $0x30] sm:$0xff] }
 0x258   : > { %2863 = vst [vmem:[%s4424_s23 + $0x30] sm:$0xff] %v4481_v24  ;;  %v4493_v55 = vadd.f32 %v1619_v50, %v4415_v43  ;;  %v1621_v57 = vpop.f32.mrb[47].mxu0  ;;  %2015 = vmatmul.mubr.bf16.vlgmr.msra.gmra.mrb[32].mxu1 %v4483_v3  ;;  %v1730_v58 = vmul.f32 %v3660_v20, %v1714_v21 }
 0x259   : > { %v3662_v60 = vpop.eup %3661  ;;  %v1670_v61 = vmul.f32 0.5, %v3358_v49  ;;  %2879 = vst [vmem:[%s4431_s29 + $0x30] sm:$0xff] %v3358_v49  ;;  %v3360_v63 = vadd.f32 %v1621_v57, %v4418_v17  ;;  %2096 = vmatpush1.bf16.msra.mxu1 %v3599_v48  ;;  %2024 = vmatprep.mubr.bf16.mxu1 %v3794_v0  ;;  %v1719_v57 = vld [vmem:[%s4455_s22 + $0x38] sm:$0xff] }
 0x25a   : > { %2864 = vst [vmem:[%s4424_s23 + $0x38] sm:$0xff] %v4493_v55  ;;  %2097 = vmatprep.subr.bf16.mxu1 %v3604_v40  ;;  %v1731_v4 = vmul.f32 %v3662_v60, %v1715_v53  ;;  %v1746_v5 = vadd.f32 %v4441_v1, %v1730_v58  ;;  %v3605_v1 = vld [vmem:[%s4816_s5 + $0x48] ss:$16 sps:$4 sm:$0xff]  }
 0x25b   : > { %v1692_v8 = vmul.f32 1.442695, %v1670_v61  ;;  %v1671_v9 = vmul.f32 0.5, %v3360_v63  ;;  %2880 = vst [vmem:[%s4431_s29 + $0x38] sm:$0xff] %v3360_v63 }
 0x25c   : > { %v1747_v11 = vadd.f32 %v4447_v33, %v1731_v4  ;;  %v3610_v33 = vld [vmem:[%s4816_s5 + $0x6c] ss:$16 sps:$4 sm:$0xff]   ;;  %v3614_v4 = vld [vmem:[%s4816_s5 + $0xa8] ss:$16 sps:$4 sm:$0xff]  }
 0x25d   : > { %3667 = vpow2.f32 %v1692_v8  ;;  %v1694_v13 = vmul.f32 1.442695, %v1671_v9  ;;  %v1625_v14 = vpop.f32.mrb[48].mxu0  ;;  %2098 = vmatpush1.bf16.msra.mxu1 %v3602_v32  ;;  %v3619_v8 = vld [vmem:[%s4816_s5 + $0xcc] ss:$16 sps:$4 sm:$0xff]  }
 0x25e   : > { %v4515_v18 = vadd.f32 %v1625_v14, %v4415_v43  ;;  %v1627_v19 = vpop.f32.mrb[49].mxu0  ;;  %v4517_v22 = vpack.c.bf16 %v1747_v11, %v1746_v5  ;;  %2099 = vmatprep.subr.bf16.mxu1 %v3607_v7  ;;  %v1720_v14 = vld [vmem:[%s4455_s22 + $0x40] sm:$0xff] }
 0x25f   : > { %v3664_v23 = vpop.eup %3663  ;;  %3669 = vpow2.f32 %v1694_v13  ;;  %v3362_v25 = vadd.f32 %v1627_v19, %v4418_v17  ;;  %v1629_v26 = vpop.f32.mrb[50].mxu0 }
 0x260   : > { %2865 = vst [vmem:[%s4424_s23 + $0x40] sm:$0xff] %v4515_v18  ;;  %v4527_v35 = vadd.f32 %v1629_v26, %v4415_v43  ;;  %v1631_v36 = vpop.f32.mrb[51].mxu0  ;;  %2025 = vmatmul.mubr.bf16.gmra.mrb[36].mxu1 %v4517_v22  ;;  %v1732_v37 = vmul.f32 %v3664_v23, %v1716_v15  ;;  %v1721_v26 = vld [vmem:[%s4455_s22 + $0x48] sm:$0xff] }
 0x261   : > { %v3666_v39 = vpop.eup %3665  ;;  %v1672_v41 = vmul.f32 0.5, %v3362_v25  ;;  %2881 = vst [vmem:[%s4431_s29 + $0x40] sm:$0xff] %v3362_v25  ;;  %v3364_v42 = vadd.f32 %v1631_v36, %v4418_v17  ;;  %2034 = vmatprep.mubr.bf16.mxu1 %v3794_v0  ;;  %2100 = vmatpush1.bf16.msra.mxu1 %v3605_v1 }
 0x262   : > { %2866 = vst [vmem:[%s4424_s23 + $0x48] sm:$0xff] %v4527_v35  ;;  %v1733_v52 = vmul.f32 %v3666_v39, %v1717_v30  ;;  %v1748_v45 = vadd.f32 %v4462_v16, %v1732_v37  ;;  %2101 = vmatprep.subr.bf16.mxu1 %v3610_v33  ;;  %v3611_v16 = vld [vmem:[%s4816_s5 + $0x88] ss:$16 sps:$4 sm:$0xff]  }
 0x263   : > { %v1696_v47 = vmul.f32 1.442695, %v1672_v41  ;;  %v1673_v2 = vmul.f32 0.5, %v3364_v42  ;;  %2882 = vst [vmem:[%s4431_s29 + $0x48] sm:$0xff] %v3364_v42  ;;  %v3620_v41 = vld [vmem:[%s4816_s5 + $0xe8] ss:$16 sps:$4 sm:$0xff]  }
 0x264   : > { %v1749_v6 = vadd.f32 %v4469_v27, %v1733_v52  ;;  %v3616_v27 = vld [vmem:[%s4816_s5 + $0xac] ss:$16 sps:$4 sm:$0xff]  }
 0x265   : > { %3671 = vpow2.f32 %v1696_v47  ;;  %v1698_v48 = vmul.f32 1.442695, %v1673_v2  ;;  %v1635_v21 = vpop.f32.mrb[52].mxu0  ;;  %2102 = vmatpush1.bf16.msra.mxu1 %v3608_v44 }
 0x266   : > { %v4549_v40 = vadd.f32 %v1635_v21, %v4415_v43  ;;  %v1637_v20 = vpop.f32.mrb[53].mxu0  ;;  %v4551_v49 = vpack.c.bf16 %v1749_v6, %v1748_v45  ;;  %2103 = vmatprep.subr.bf16.mxu1 %v3613_v46  ;;  %v1722_v6 = vld [vmem:[%s4455_s22 + $0x50] sm:$0xff] }
 0x267   : > { %v3668_v50 = vpop.eup %3667  ;;  %3673 = vpow2.f32 %v1698_v48  ;;  %v3366_v53 = vadd.f32 %v1637_v20, %v4418_v17  ;;  %v1639_v54 = vpop.f32.mrb[54].mxu0 }
 0x268   : > { %2867 = vst [vmem:[%s4424_s23 + $0x50] sm:$0xff] %v4549_v40  ;;  %v4561_v58 = vadd.f32 %v1639_v54, %v4415_v43  ;;  %v1641_v59 = vpop.f32.mrb[55].mxu0  ;;  %2035 = vmatmul.mubr.bf16.gmra.mrb[40].mxu1 %v4551_v49  ;;  %v1734_v60 = vmul.f32 %v3668_v50, %v1718_v62 }
 0x269   : > { %v3670_v61 = vpop.eup %3669  ;;  %v1674_v63 = vmul.f32 0.5, %v3366_v53  ;;  %2883 = vst [vmem:[%s4431_s29 + $0x50] sm:$0xff] %v3366_v53  ;;  %v3368_v32 = vadd.f32 %v1641_v59, %v4418_v17  ;;  %2044 = vmatprep.mubr.bf16.mxu1 %v3794_v0  ;;  %2104 = vmatpush1.bf16.msra.mxu1 %v3611_v16 }
 0x26a   : > { %2868 = vst [vmem:[%s4424_s23 + $0x58] sm:$0xff] %v4561_v58  ;;  %v1735_v5 = vmul.f32 %v3670_v61, %v1719_v57  ;;  %v1750_v7 = vadd.f32 %v4481_v24, %v1734_v60  ;;  %2105 = vmatprep.subr.bf16.mxu1 %v3616_v27  ;;  %v3617_v24 = vld [vmem:[%s4816_s5 + $0xc8] ss:$16 sps:$4 sm:$0xff]  }
 0x26b   : > { %v1700_v9 = vmul.f32 1.442695, %v1674_v63  ;;  %v1675_v10 = vmul.f32 0.5, %v3368_v32  ;;  %2884 = vst [vmem:[%s4431_s29 + $0x58] sm:$0xff] %v3368_v32  ;;  %v1723_v27 = vld [vmem:[%s4455_s22 + $0x58] sm:$0xff] }
 0x26c   : > { %v1751_v11 = vadd.f32 %v4493_v55, %v1735_v5  ;;  %v3622_v55 = vld [vmem:[%s4816_s5 + $0xec] ss:$16 sps:$4 sm:$0xff]   ;;  %v1724_v5 = vld [vmem:[%s4455_s22 + $0x60] sm:$0xff] }
 0x26d   : > { %3675 = vpow2.f32 %v1700_v9  ;;  %v1702_v12 = vmul.f32 1.442695, %v1675_v10  ;;  %v1645_v13 = vpop.f32.mrb[56].mxu0  ;;  %2106 = vmatpush1.bf16.msra.mxu1 %v3614_v4 }
 0x26e   : > { %v4583_v1 = vadd.f32 %v1645_v13, %v4415_v43  ;;  %v1647_v15 = vpop.f32.mrb[57].mxu0  ;;  %v4585_v19 = vpack.c.bf16 %v1751_v11, %v1750_v7  ;;  %2107 = vmatprep.subr.bf16.mxu1 %v3619_v8  ;;  %v1726_v13 = vld [vmem:[%s4455_s22 + $0x70] sm:$0xff] }
 0x26f   : > { %v3672_v33 = vpop.eup %3671  ;;  %3677 = vpow2.f32 %v1702_v12  ;;  %v3370_v23 = vadd.f32 %v1647_v15, %v4418_v17  ;;  %v1649_v25 = vpop.f32.mrb[58].mxu0 }
 0x270   : > { %2869 = vst [vmem:[%s4424_s23 + $0x60] sm:$0xff] %v4583_v1  ;;  %v3371_v30 = vadd.f32 %v1649_v25, %v4415_v43  ;;  %v1651_v34 = vpop.f32.mrb[59].mxu0  ;;  %2045 = vmatmul.mubr.bf16.gmra.mrb[44].mxu1 %v4585_v19  ;;  %v1736_v36 = vmul.f32 %v3672_v33, %v1720_v14 }
 0x271   : > { %v3674_v37 = vpop.eup %3673  ;;  %v1676_v38 = vmul.f32 0.5, %v3370_v23  ;;  %2885 = vst [vmem:[%s4431_s29 + $0x60] sm:$0xff] %v3370_v23  ;;  %v3372_v39 = vadd.f32 %v1651_v34, %v4418_v17  ;;  %2054 = vmatprep.mubr.bf16.mxu1 %v3794_v0  ;;  %2108 = vmatpush1.bf16.msra.mxu1 %v3617_v24  ;;  %v1727_v24 = vld [vmem:[%s4455_s22 + $0x78] sm:$0xff]  ;;  %v3636_v34 = vld [vmem:[#allocation2 + $0x30] sm:$0xff]  }
 0x272   : > { %2870 = vst [vmem:[%s4424_s23 + $0x68] sm:$0xff] %v3371_v30  ;;  %v1737_v42 = vmul.f32 %v3674_v37, %v1721_v26  ;;  %v1752_v44 = vadd.f32 %v4515_v18, %v1736_v36  ;;  %2109 = vmatprep.subr.bf16.mxu1 %v3622_v55  ;;  %v3637_v36 = vld [vmem:[#allocation2 + $0x78] sm:$0xff]   ;;  %v3641_v37 = vld [vmem:[#allocation2 + $0xc8] sm:$0xff]  }
 0x273   : > { %v1704_v52 = vmul.f32 1.442695, %v1676_v38  ;;  %v1677_v45 = vmul.f32 0.5, %v3372_v39  ;;  %2886 = vst [vmem:[%s4431_s29 + $0x68] sm:$0xff] %v3372_v39  ;;  %v3642_v38 = vld [vmem:[#allocation2 + $0x88] sm:$0xff]   ;;  %v3644_v39 = vld [vmem:[#allocation2 + $0x90] sm:$0xff]  }
 0x274   : > { %v1753_v46 = vadd.f32 %v4527_v35, %v1737_v42  ;;  %v3646_v42 = vld [vmem:[#allocation2 + $0x98] sm:$0xff]  }
 0x275   : > { %3679 = vpow2.f32 %v1704_v52  ;;  %v1706_v47 = vmul.f32 1.442695, %v1677_v45  ;;  %v1655_v2 = vpop.f32.mrb[60].mxu0  ;;  %2110 = vmatpush1.bf16.msra.mxu1 %v3620_v41  ;;  %v3645_v41 = vld [vmem:[#allocation2 + $0xd8] sm:$0xff]   ;;  %v3648_v52 = vld [vmem:[#allocation2 + $0xa0] sm:$0xff]   ;;  %v3649_v45 = vld [vmem:[#allocation2 + $0xe8] sm:$0xff]  }
 0x276   : > { %v3373_v48 = vadd.f32 %v1655_v2, %v4415_v43  ;;  %v1657_v21 = vpop.f32.mrb[61].mxu0  ;;  %v4608_v62 = vpack.c.bf16 %v1753_v46, %v1752_v44  ;;  %v3647_v44 = vld [vmem:[#allocation2 + $0xe0] sm:$0xff]   ;;  %v3650_v46 = vld [vmem:[#allocation2 + $0xa8] sm:$0xff]   ;;  %v3652_v2 = vld [vmem:[#allocation2 + $0xb0] sm:$0xff]  }
 0x277   : > { %v3676_v18 = vpop.eup %3675  ;;  %3681 = vpow2.f32 %v1706_v47  ;;  %v3374_v16 = vadd.f32 %v1657_v21, %v4418_v17  ;;  %v1659_v20 = vpop.f32.mrb[62].mxu0  ;;  %v3651_v47 = vld [vmem:[#allocation2 + $0xf0] sm:$0xff]  }
 0x278   : > { %2871 = vst [vmem:[%s4424_s23 + $0x70] sm:$0xff] %v3373_v48  ;;  %v3375_v35 = vadd.f32 %v1659_v20, %v4415_v43  ;;  %v1661_v50 = vpop.f32.mrb[63].mxu0  ;;  %2055 = vmatmul.mubr.bf16.gmra.mrb[48].mxu1 %v4608_v62  ;;  %v1738_v53 = vmul.f32 %v3676_v18, %v1722_v6  ;;  %v3654_v6 = vld [vmem:[#allocation2 + $0xb8] sm:$0xff]  }
 0x279   : > { %v3678_v54 = vpop.eup %3677  ;;  %v1678_v57 = vmul.f32 0.5, %v3374_v16  ;;  %2887 = vst [vmem:[%s4431_s29 + $0x70] sm:$0xff] %v3374_v16  ;;  %v3376_v59 = vadd.f32 %v1661_v50, %v4418_v17  ;;  %2064 = vmatprep.mubr.bf16.mxu1 %v3794_v0  ;;  %v1725_v17 = vld [vmem:[%s4455_s22 + $0x68] sm:$0xff] }
 0x27a   : > { %2872 = vst [vmem:[%s4424_s23 + $0x78] sm:$0xff] %v3375_v35  ;;  %v1739_v60 = vmul.f32 %v3678_v54, %v1723_v27  ;;  %v1754_v61 = vadd.f32 %v4549_v40, %v1738_v53 }
 0x27b   : > { %v1708_v63 = vmul.f32 1.442695, %v1678_v57  ;;  %v1679_v32 = vmul.f32 0.5, %v3376_v59  ;;  %2888 = vst [vmem:[%s4431_s29 + $0x78] sm:$0xff] %v3376_v59 }
 0x27c   : > { %v1755_v43 = vadd.f32 %v4561_v58, %v1739_v60 }
 0x27d   : > { %3683 = vpow2.f32 %v1708_v63  ;;  %v1710_v4 = vmul.f32 1.442695, %v1679_v32 }
 0x27e   : > { %v1765_v7 = vpack.c.bf16 %v1755_v43, %v1754_v61 }
 0x27f   : > { %v3680_v8 = vpop.eup %3679  ;;  %3685 = vpow2.f32 %v1710_v4 }
 0x280   : > { %2065 = vmatmul.mubr.bf16.gmra.mrb[52].mxu1 %v1765_v7  ;;  %v1740_v9 = vmul.f32 %v3680_v8, %v1724_v5 }
 0x281   : > { %v3682_v10 = vpop.eup %3681  ;;  %2074 = vmatprep.mubr.bf16.mxu1 %v3794_v0 }
 0x282   : > { %v1741_v40 = vmul.f32 %v3682_v10, %v1725_v17  ;;  %v1756_v11 = vadd.f32 %v4583_v1, %v1740_v9  ;;  %v3634_v1 = vld [vmem:[#allocation2 + $0x28] sm:$0xff]  }
 0x283   : > { %3228 = vmatpush3.bf16.msra.mxu0 %v3634_v1 }
 0x284   : > { %v1757_v12 = vadd.f32 %v3371_v30, %v1741_v40  ;;  %v3635_v30 = vld [vmem:[#allocation2 + $0x70] sm:$0xff]  }
 0x285   : > { %3229 = vmatprep.subr.bf16.mxu0 %v3635_v30 }
 0x286   : > { %v1766_v14 = vpack.c.bf16 %v1757_v12, %v1756_v11 }
 0x287   : > { %v3684_v58 = vpop.eup %3683  ;;  %3230 = vmatpush3.bf16.msra.mxu0 %v3636_v34 }
 0x288   : > { %2075 = vmatmul.mubr.bf16.gmra.mrb[56].mxu1 %v1766_v14  ;;  %v1742_v15 = vmul.f32 %v3684_v58, %v1726_v13  ;;  %3231 = vmatprep.subr.bf16.mxu0 %v3637_v36 }
 0x289   : > { %v3686_v55 = vpop.eup %3685  ;;  %2084 = vmatprep.mubr.bf16.mxu1 %v3794_v0 }
 0x28a   : > { %v1743_v33 = vmul.f32 %v3686_v55, %v1727_v24  ;;  %v1758_v23 = vadd.f32 %v3373_v48, %v1742_v15  ;;  %v4645_v48 = vld [vmem:[%s4817_s6] sm:$0xf] }
 0x28b   : > { %v4649_v21 = vrot.slane %v4645_v48, %v4149_v29 }
 0x28c   : > { %v1759_v25 = vadd.f32 %v3375_v35, %v1743_v33 }
 0x28e   : > { %v1767_v26 = vpack.c.bf16 %v1759_v25, %v1758_v23 }
 0x290   : > { %2085 = vmatmul.mubr.bf16.gmra.mrb[60].mxu1 %v1767_v26 }
 0x291   : > { %2127 = vmatprep.mubr.bf16.mxu1 %v3794_v0 }
 0x298   : > { %2128 = vmatmul.mubr.bf16.vlgmr.msra.gmra.mrb[64].mxu1 %v4483_v3  ;;  %v3638_v3 = vld [vmem:[#allocation2 + $0x38] sm:$0xff]  }
 0x299   : > { %2137 = vmatprep.mubr.bf16.mxu1 %v3794_v0  ;;  %3232 = vmatpush3.bf16.msra.mxu0 %v3638_v3 }
 0x2a0   : > { %2138 = vmatmul.mubr.bf16.gmra.mrb[68].mxu1 %v4517_v22  ;;  %v3639_v22 = vld [vmem:[#allocation2 + $0xc0] sm:$0xff]  }
 0x2a1   : > { %2147 = vmatprep.mubr.bf16.mxu1 %v3794_v0  ;;  %3281 = vmatprep.subr.bf16.mxu1 %v3639_v22 }
 0x2a8   : > { %2148 = vmatmul.mubr.bf16.gmra.mrb[72].mxu1 %v4551_v49  ;;  %v3640_v49 = vld [vmem:[#allocation2 + $0x80] sm:$0xff]  }
 0x2a9   : > { %2157 = vmatprep.mubr.bf16.mxu1 %v3794_v0  ;;  %3282 = vmatpush3.bf16.msra.mxu1 %v3640_v49 }
 0x2aa   : > { %3283 = vmatprep.subr.bf16.mxu1 %v3641_v37 }
 0x2ad   : > { %3284 = vmatpush3.bf16.msra.mxu1 %v3642_v38 }
 0x2b0   : > { %2158 = vmatmul.mubr.bf16.gmra.mrb[76].mxu1 %v4585_v19  ;;  %v3643_v19 = vld [vmem:[#allocation2 + $0xd0] sm:$0xff]  }
 0x2b1   : > { %2167 = vmatprep.mubr.bf16.mxu1 %v3794_v0  ;;  %3285 = vmatprep.subr.bf16.mxu1 %v3643_v19 }
 0x2b2   : > { %3286 = vmatpush3.bf16.msra.mxu1 %v3644_v39 }
 0x2b3   : > { %3287 = vmatprep.subr.bf16.mxu1 %v3645_v41 }
 0x2b6   : > { %3288 = vmatpush3.bf16.msra.mxu1 %v3646_v42 }
 0x2b7   : > { %3289 = vmatprep.subr.bf16.mxu1 %v3647_v44 }
 0x2b8   : > { %2168 = vmatmul.mubr.bf16.gmra.mrb[80].mxu1 %v4608_v62  ;;  %v4653_v62 = vrot.slane %v4645_v48, %v4155_v31 }
 0x2b9   : > { %2177 = vmatprep.mubr.bf16.mxu1 %v3794_v0 }
 0x2ba   : > { %3290 = vmatpush3.bf16.msra.mxu1 %v3648_v52 }
 0x2bb   : > { %3291 = vmatprep.subr.bf16.mxu1 %v3649_v45 }
 0x2be   : > { %3292 = vmatpush3.bf16.msra.mxu1 %v3650_v46 }
 0x2bf   : > { %3293 = vmatprep.subr.bf16.mxu1 %v3651_v47 }
 0x2c0   : > { %2178 = vmatmul.mubr.bf16.gmra.mrb[84].mxu1 %v1765_v7 }
 0x2c1   : > { %2187 = vmatprep.mubr.bf16.mxu1 %v3794_v0 }
 0x2c2   : > { %3294 = vmatpush3.bf16.msra.mxu1 %v3652_v2 }
 0x2c8   : > { %2188 = vmatmul.mubr.bf16.gmra.mrb[88].mxu1 %v1766_v14 }
 0x2c9   : > { %2197 = vmatprep.mubr.bf16.mxu1 %v3794_v0  ;;  %v3653_v0 = vld [vmem:[#allocation2 + $0xf8] sm:$0xff]  }
 0x2ca   : > { %3295 = vmatprep.subr.bf16.mxu1 %v3653_v0 }
 0x2cb   : > { %3296 = vmatpush3.bf16.msra.mxu1 %v3654_v6 }
 0x2d0   : > { %2198 = vmatmul.mubr.bf16.gmra.mrb[92].mxu1 %v1767_v26 }
 0x32b   : > { %v2016_v18 = vpop.f32.mrb[32].mxu1 }
 0x32c   : > { %v2017_v16 = vadd.f32 %v2016_v18, %v4649_v21  ;;  %v2018_v20 = vpop.f32.mrb[33].mxu1 }
 0x32d   : > { %v2019_v27 = vadd.f32 %v2018_v20, %v4653_v62  ;;  %v2020_v35 = vpop.f32.mrb[34].mxu1 }
 0x32e   : > { %v2021_v50 = vadd.f32 %v2020_v35, %v4649_v21  ;;  %v2022_v53 = vpop.f32.mrb[35].mxu1  ;;  %v2208_v57 = vmax.f32 %v2017_v16, 0.0 }
 0x32f   : > { %v2023_v54 = vadd.f32 %v2022_v53, %v4653_v62  ;;  %v2209_v29 = vmax.f32 %v2019_v27, 0.0 }
 0x330   : > { %v2212_v59 = vmax.f32 %v2021_v50, 0.0 }
 0x331   : > { %v2213_v60 = vmax.f32 %v2023_v54, 0.0 }
 0x332   : > { %v2272_v61 = vpack.c.bf16 %v2212_v59, %v2208_v57 }
 0x333   : > { %v2273_v63 = vpack.c.bf16 %v2213_v60, %v2209_v29  ;;  %v2026_v31 = vpop.f32.mrb[36].mxu1 }
 0x334   : > { %v2027_v32 = vadd.f32 %v2026_v31, %v4649_v21  ;;  %v2028_v43 = vpop.f32.mrb[37].mxu1 }
 0x335   : > { %v2029_v4 = vadd.f32 %v2028_v43, %v4653_v62  ;;  %v2030_v5 = vpop.f32.mrb[38].mxu1  ;;  %2599 = vmatprep.mubr.bf16.mxu0 %v2273_v63 }
 0x336   : > { %v2031_v7 = vadd.f32 %v2030_v5, %v4649_v21  ;;  %v2032_v8 = vpop.f32.mrb[39].mxu1  ;;  %2600 = vmatmul.mubr.bf16.vlgmr.msra.gmra.mrb[64].mxu0 %v2272_v61  ;;  %v2216_v9 = vmax.f32 %v2027_v32, 0.0 }
 0x337   : > { %v2033_v17 = vadd.f32 %v2032_v8, %v4653_v62  ;;  %v2217_v40 = vmax.f32 %v2029_v4, 0.0 }
 0x338   : > { %v2220_v10 = vmax.f32 %v2031_v7, 0.0 }
 0x339   : > { %v2221_v11 = vmax.f32 %v2033_v17, 0.0 }
 0x33a   : > { %v2276_v12 = vpack.c.bf16 %v2220_v10, %v2216_v9 }
 0x33b   : > { %v2277_v13 = vpack.c.bf16 %v2221_v11, %v2217_v40  ;;  %v2036_v14 = vpop.f32.mrb[40].mxu1 }
 0x33c   : > { %v2037_v58 = vadd.f32 %v2036_v14, %v4649_v21  ;;  %v2038_v24 = vpop.f32.mrb[41].mxu1 }
 0x33d   : > { %v2039_v15 = vadd.f32 %v2038_v24, %v4653_v62  ;;  %v2040_v55 = vpop.f32.mrb[42].mxu1  ;;  %2607 = vmatprep.mubr.bf16.mxu0 %v2277_v13 }
 0x33e   : > { %v2041_v33 = vadd.f32 %v2040_v55, %v4649_v21  ;;  %v2042_v23 = vpop.f32.mrb[43].mxu1  ;;  %2608 = vmatmul.mubr.bf16.gmra.mrb[68].mxu0 %v2276_v12  ;;  %v2224_v26 = vmax.f32 %v2037_v58, 0.0 }
 0x33f   : > { %v2043_v25 = vadd.f32 %v2042_v23, %v4653_v62  ;;  %v2225_v30 = vmax.f32 %v2039_v15, 0.0 }
 0x340   : > { %v2228_v1 = vmax.f32 %v2041_v33, 0.0 }
 0x341   : > { %v2229_v34 = vmax.f32 %v2043_v25, 0.0 }
 0x342   : > { %v2280_v36 = vpack.c.bf16 %v2228_v1, %v2224_v26 }
 0x343   : > { %v2281_v3 = vpack.c.bf16 %v2229_v34, %v2225_v30  ;;  %v2046_v22 = vpop.f32.mrb[44].mxu1 }
 0x344   : > { %v2047_v49 = vadd.f32 %v2046_v22, %v4649_v21  ;;  %v2048_v37 = vpop.f32.mrb[45].mxu1 }
 0x345   : > { %v2049_v38 = vadd.f32 %v2048_v37, %v4653_v62  ;;  %v2050_v19 = vpop.f32.mrb[46].mxu1  ;;  %2615 = vmatprep.mubr.bf16.mxu0 %v2281_v3 }
 0x346   : > { %v2051_v39 = vadd.f32 %v2050_v19, %v4649_v21  ;;  %v2052_v41 = vpop.f32.mrb[47].mxu1  ;;  %2616 = vmatmul.mubr.bf16.gmra.mrb[72].mxu0 %v2280_v36  ;;  %v2232_v44 = vmax.f32 %v2047_v49, 0.0 }
 0x347   : > { %v2053_v42 = vadd.f32 %v2052_v41, %v4653_v62  ;;  %v2233_v45 = vmax.f32 %v2049_v38, 0.0 }
 0x348   : > { %v2236_v52 = vmax.f32 %v2051_v39, 0.0 }
 0x349   : > { %v2237_v46 = vmax.f32 %v2053_v42, 0.0 }
 0x34a   : > { %v2284_v47 = vpack.c.bf16 %v2236_v52, %v2232_v44  ;;  %v4690_v44 = vrot.slane %v4645_v48, %v550_v51 }
 0x34b   : > { %v2285_v2 = vpack.c.bf16 %v2237_v46, %v2233_v45  ;;  %v2056_v0 = vpop.f32.mrb[48].mxu1  ;;  %v4695_v46 = vrot.slane %v4645_v48, %v554_v56 }
 0x34c   : > { %v2057_v6 = vadd.f32 %v2056_v0, %v4649_v21  ;;  %v2058_v18 = vpop.f32.mrb[49].mxu1 }
 0x34d   : > { %v2059_v16 = vadd.f32 %v2058_v18, %v4653_v62  ;;  %v2060_v20 = vpop.f32.mrb[50].mxu1  ;;  %2623 = vmatprep.mubr.bf16.mxu0 %v2285_v2 }
 0x34e   : > { %v2061_v27 = vadd.f32 %v2060_v20, %v4649_v21  ;;  %v2062_v35 = vpop.f32.mrb[51].mxu1  ;;  %2624 = vmatmul.mubr.bf16.gmra.mrb[76].mxu0 %v2284_v47  ;;  %v2240_v53 = vmax.f32 %v2057_v6, 0.0 }
 0x34f   : > { %v2063_v50 = vadd.f32 %v2062_v35, %v4653_v62  ;;  %v2241_v57 = vmax.f32 %v2059_v16, 0.0 }
 0x350   : > { %v2244_v54 = vmax.f32 %v2061_v27, 0.0 }
 0x351   : > { %v2245_v59 = vmax.f32 %v2063_v50, 0.0 }
 0x352   : > { %v2288_v29 = vpack.c.bf16 %v2244_v54, %v2240_v53 }
 0x353   : > { %v2289_v60 = vpack.c.bf16 %v2245_v59, %v2241_v57  ;;  %v2066_v61 = vpop.f32.mrb[52].mxu1 }
 0x354   : > { %v2067_v63 = vadd.f32 %v2066_v61, %v4649_v21  ;;  %v2068_v31 = vpop.f32.mrb[53].mxu1 }
 0x355   : > { %v2069_v32 = vadd.f32 %v2068_v31, %v4653_v62  ;;  %v2070_v43 = vpop.f32.mrb[54].mxu1  ;;  %2631 = vmatprep.mubr.bf16.mxu0 %v2289_v60 }
 0x356   : > { %v2071_v4 = vadd.f32 %v2070_v43, %v4649_v21  ;;  %v2072_v5 = vpop.f32.mrb[55].mxu1  ;;  %2632 = vmatmul.mubr.bf16.gmra.mrb[80].mxu0 %v2288_v29  ;;  %v2248_v8 = vmax.f32 %v2067_v63, 0.0 }
 0x357   : > { %v2073_v7 = vadd.f32 %v2072_v5, %v4653_v62  ;;  %v2249_v9 = vmax.f32 %v2069_v32, 0.0 }
 0x358   : > { %v2252_v17 = vmax.f32 %v2071_v4, 0.0 }
 0x359   : > { %v2253_v10 = vmax.f32 %v2073_v7, 0.0 }
 0x35a   : > { %v2292_v40 = vpack.c.bf16 %v2252_v17, %v2248_v8 }
 0x35b   : > { %v2293_v11 = vpack.c.bf16 %v2253_v10, %v2249_v9  ;;  %v2076_v12 = vpop.f32.mrb[56].mxu1 }
 0x35c   : > { %v2077_v13 = vadd.f32 %v2076_v12, %v4649_v21  ;;  %v2078_v14 = vpop.f32.mrb[57].mxu1 }
 0x35d   : > { %v2079_v58 = vadd.f32 %v2078_v14, %v4653_v62  ;;  %v2080_v24 = vpop.f32.mrb[58].mxu1  ;;  %2639 = vmatprep.mubr.bf16.mxu0 %v2293_v11 }
 0x35e   : > { %v2081_v15 = vadd.f32 %v2080_v24, %v4649_v21  ;;  %v2082_v55 = vpop.f32.mrb[59].mxu1  ;;  %2640 = vmatmul.mubr.bf16.gmra.mrb[84].mxu0 %v2292_v40  ;;  %v2256_v23 = vmax.f32 %v2077_v13, 0.0 }
 0x35f   : > { %v2083_v33 = vadd.f32 %v2082_v55, %v4653_v62  ;;  %v2257_v26 = vmax.f32 %v2079_v58, 0.0 }
 0x360   : > { %v2260_v25 = vmax.f32 %v2081_v15, 0.0 }
 0x361   : > { %v2261_v1 = vmax.f32 %v2083_v33, 0.0 }
 0x362   : > { %v2296_v30 = vpack.c.bf16 %v2260_v25, %v2256_v23 }
 0x363   : > { %v2297_v34 = vpack.c.bf16 %v2261_v1, %v2257_v26  ;;  %v2086_v36 = vpop.f32.mrb[60].mxu1 }
 0x364   : > { %v2087_v3 = vadd.f32 %v2086_v36, %v4649_v21  ;;  %v2088_v22 = vpop.f32.mrb[61].mxu1 }
 0x365   : > { %v2089_v49 = vadd.f32 %v2088_v22, %v4653_v62  ;;  %v2090_v37 = vpop.f32.mrb[62].mxu1  ;;  %2647 = vmatprep.mubr.bf16.mxu0 %v2297_v34 }
 0x366   : > { %v2091_v38 = vadd.f32 %v2090_v37, %v4649_v21  ;;  %v2092_v19 = vpop.f32.mrb[63].mxu1  ;;  %2648 = vmatmul.mubr.bf16.gmra.mrb[88].mxu0 %v2296_v30  ;;  %v2264_v41 = vmax.f32 %v2087_v3, 0.0 }
 0x367   : > { %v2093_v39 = vadd.f32 %v2092_v19, %v4653_v62  ;;  %v2265_v52 = vmax.f32 %v2089_v49, 0.0 }
 0x368   : > { %v2268_v42 = vmax.f32 %v2091_v38, 0.0 }
 0x369   : > { %v2269_v45 = vmax.f32 %v2093_v39, 0.0 }
 0x36a   : > { %v2300_v47 = vpack.c.bf16 %v2268_v42, %v2264_v41 }
 0x36b   : > { %v2301_v21 = vpack.c.bf16 %v2269_v45, %v2265_v52  ;;  %v2129_v2 = vpop.f32.mrb[64].mxu1 }
 0x36c   : > { %v2130_v0 = vadd.f32 %v2129_v2, %v4690_v44  ;;  %v2131_v62 = vpop.f32.mrb[65].mxu1 }
 0x36d   : > { %v2132_v6 = vadd.f32 %v2131_v62, %v4695_v46  ;;  %v2133_v18 = vpop.f32.mrb[66].mxu1  ;;  %2655 = vmatprep.mubr.bf16.mxu0 %v2301_v21 }
 0x36e   : > { %v2134_v51 = vadd.f32 %v2133_v18, %v4690_v44  ;;  %v2135_v16 = vpop.f32.mrb[67].mxu1  ;;  %2656 = vmatmul.mubr.bf16.gmra.mrb[92].mxu0 %v2300_v47  ;;  %v2210_v28 = vmax.f32 %v2130_v0, 0.0 }
 0x36f   : > { %v2136_v20 = vadd.f32 %v2135_v16, %v4695_v46  ;;  %v2211_v56 = vmax.f32 %v2132_v6, 0.0 }
 0x370   : > { %v2214_v27 = vmax.f32 %v2134_v51, 0.0 }
 0x371   : > { %v2215_v48 = vmax.f32 %v2136_v20, 0.0 }
 0x372   : > { %v2274_v35 = vpack.c.bf16 %v2214_v27, %v2210_v28 }
 0x373   : > { %v2275_v50 = vpack.c.bf16 %v2215_v48, %v2211_v56  ;;  %v2139_v53 = vpop.f32.mrb[68].mxu1 }
 0x374   : > { %v2140_v54 = vadd.f32 %v2139_v53, %v4690_v44  ;;  %v2141_v57 = vpop.f32.mrb[69].mxu1 }
 0x375   : > { %v2142_v59 = vadd.f32 %v2141_v57, %v4695_v46  ;;  %v2143_v29 = vpop.f32.mrb[70].mxu1  ;;  %2696 = vmatprep.mubr.bf16.mxu1 %v2275_v50 }
 0x376   : > { %v2144_v60 = vadd.f32 %v2143_v29, %v4690_v44  ;;  %v2145_v61 = vpop.f32.mrb[71].mxu1  ;;  %2697 = vmatmul.mubr.bf16.vlgmr.msra.gmra.mrb[96].mxu1 %v2274_v35  ;;  %v2218_v31 = vmax.f32 %v2140_v54, 0.0 }
 0x377   : > { %v2146_v63 = vadd.f32 %v2145_v61, %v4695_v46  ;;  %v2219_v43 = vmax.f32 %v2142_v59, 0.0 }
 0x378   : > { %v2222_v32 = vmax.f32 %v2144_v60, 0.0 }
 0x379   : > { %v2223_v4 = vmax.f32 %v2146_v63, 0.0 }
 0x37a   : > { %v2278_v5 = vpack.c.bf16 %v2222_v32, %v2218_v31 }
 0x37b   : > { %v2279_v7 = vpack.c.bf16 %v2223_v4, %v2219_v43  ;;  %v2149_v8 = vpop.f32.mrb[72].mxu1 }
 0x37c   : > { %v2150_v17 = vadd.f32 %v2149_v8, %v4690_v44  ;;  %v2151_v9 = vpop.f32.mrb[73].mxu1 }
 0x37d   : > { %v2152_v10 = vadd.f32 %v2151_v9, %v4695_v46  ;;  %v2153_v40 = vpop.f32.mrb[74].mxu1  ;;  %2704 = vmatprep.mubr.bf16.mxu1 %v2279_v7 }
 0x37e   : > { %v2154_v11 = vadd.f32 %v2153_v40, %v4690_v44  ;;  %v2155_v12 = vpop.f32.mrb[75].mxu1  ;;  %2705 = vmatmul.mubr.bf16.gmra.mrb[100].mxu1 %v2278_v5  ;;  %v2226_v14 = vmax.f32 %v2150_v17, 0.0 }
 0x37f   : > { %v2156_v13 = vadd.f32 %v2155_v12, %v4695_v46  ;;  %v2227_v24 = vmax.f32 %v2152_v10, 0.0 }
 0x380   : > { %v2230_v58 = vmax.f32 %v2154_v11, 0.0 }
 0x381   : > { %v2231_v15 = vmax.f32 %v2156_v13, 0.0 }
 0x382   : > { %v2282_v55 = vpack.c.bf16 %v2230_v58, %v2226_v14 }
 0x383   : > { %v2283_v33 = vpack.c.bf16 %v2231_v15, %v2227_v24  ;;  %v2159_v23 = vpop.f32.mrb[76].mxu1 }
 0x384   : > { %v2160_v25 = vadd.f32 %v2159_v23, %v4690_v44  ;;  %v2161_v26 = vpop.f32.mrb[77].mxu1 }
 0x385   : > { %v2162_v1 = vadd.f32 %v2161_v26, %v4695_v46  ;;  %v2163_v30 = vpop.f32.mrb[78].mxu1  ;;  %2712 = vmatprep.mubr.bf16.mxu1 %v2283_v33 }
 0x386   : > { %v2164_v34 = vadd.f32 %v2163_v30, %v4690_v44  ;;  %v2165_v36 = vpop.f32.mrb[79].mxu1  ;;  %2713 = vmatmul.mubr.bf16.gmra.mrb[104].mxu1 %v2282_v55  ;;  %v2234_v22 = vmax.f32 %v2160_v25, 0.0 }
 0x387   : > { %v2166_v3 = vadd.f32 %v2165_v36, %v4695_v46  ;;  %v2235_v37 = vmax.f32 %v2162_v1, 0.0 }
 0x388   : > { %v2238_v49 = vmax.f32 %v2164_v34, 0.0 }
 0x389   : > { %v2239_v38 = vmax.f32 %v2166_v3, 0.0 }
 0x38a   : > { %v2286_v19 = vpack.c.bf16 %v2238_v49, %v2234_v22 }
 0x38b   : > { %v2287_v39 = vpack.c.bf16 %v2239_v38, %v2235_v37  ;;  %v2169_v41 = vpop.f32.mrb[80].mxu1 }
 0x38c   : > { %v2170_v42 = vadd.f32 %v2169_v41, %v4690_v44  ;;  %v2171_v52 = vpop.f32.mrb[81].mxu1 }
 0x38d   : > { %v2172_v45 = vadd.f32 %v2171_v52, %v4695_v46  ;;  %v2173_v47 = vpop.f32.mrb[82].mxu1  ;;  %2720 = vmatprep.mubr.bf16.mxu1 %v2287_v39 }
 0x38e   : > { %v2174_v21 = vadd.f32 %v2173_v47, %v4690_v44  ;;  %v2175_v2 = vpop.f32.mrb[83].mxu1  ;;  %2721 = vmatmul.mubr.bf16.gmra.mrb[108].mxu1 %v2286_v19  ;;  %v2242_v62 = vmax.f32 %v2170_v42, 0.0 }
 0x38f   : > { %v2176_v0 = vadd.f32 %v2175_v2, %v4695_v46  ;;  %v2243_v18 = vmax.f32 %v2172_v45, 0.0 }
 0x390   : > { %v2246_v6 = vmax.f32 %v2174_v21, 0.0 }
 0x391   : > { %v2247_v51 = vmax.f32 %v2176_v0, 0.0 }
 0x392   : > { %v2290_v16 = vpack.c.bf16 %v2246_v6, %v2242_v62 }
 0x393   : > { %v2291_v20 = vpack.c.bf16 %v2247_v51, %v2243_v18  ;;  %v2179_v28 = vpop.f32.mrb[84].mxu1 }
 0x394   : > { %v2180_v27 = vadd.f32 %v2179_v28, %v4690_v44  ;;  %v2181_v56 = vpop.f32.mrb[85].mxu1 }
 0x395   : > { %v2182_v48 = vadd.f32 %v2181_v56, %v4695_v46  ;;  %v2183_v35 = vpop.f32.mrb[86].mxu1  ;;  %2728 = vmatprep.mubr.bf16.mxu1 %v2291_v20 }
 0x396   : > { %v2184_v50 = vadd.f32 %v2183_v35, %v4690_v44  ;;  %v2185_v53 = vpop.f32.mrb[87].mxu1  ;;  %2729 = vmatmul.mubr.bf16.gmra.mrb[112].mxu1 %v2290_v16  ;;  %v2250_v57 = vmax.f32 %v2180_v27, 0.0 }
 0x397   : > { %v2186_v54 = vadd.f32 %v2185_v53, %v4695_v46  ;;  %v2251_v29 = vmax.f32 %v2182_v48, 0.0 }
 0x398   : > { %v2254_v59 = vmax.f32 %v2184_v50, 0.0 }
 0x399   : > { %v2255_v60 = vmax.f32 %v2186_v54, 0.0 }
 0x39a   : > { %v2294_v61 = vpack.c.bf16 %v2254_v59, %v2250_v57 }
 0x39b   : > { %v2295_v63 = vpack.c.bf16 %v2255_v60, %v2251_v29  ;;  %v2189_v31 = vpop.f32.mrb[88].mxu1 }
 0x39c   : > { %v2190_v32 = vadd.f32 %v2189_v31, %v4690_v44  ;;  %v2191_v43 = vpop.f32.mrb[89].mxu1 }
 0x39d   : > { %v2192_v4 = vadd.f32 %v2191_v43, %v4695_v46  ;;  %v2193_v5 = vpop.f32.mrb[90].mxu1  ;;  %2736 = vmatprep.mubr.bf16.mxu1 %v2295_v63 }
 0x39e   : > { %v2194_v7 = vadd.f32 %v2193_v5, %v4690_v44  ;;  %v2195_v8 = vpop.f32.mrb[91].mxu1  ;;  %2737 = vmatmul.mubr.bf16.gmra.mrb[116].mxu1 %v2294_v61  ;;  %v2258_v9 = vmax.f32 %v2190_v32, 0.0 }
 0x39f   : > { %v2196_v17 = vadd.f32 %v2195_v8, %v4695_v46  ;;  %v2259_v40 = vmax.f32 %v2192_v4, 0.0 }
 0x3a0   : > { %v2262_v10 = vmax.f32 %v2194_v7, 0.0 }
 0x3a1   : > { %v2263_v11 = vmax.f32 %v2196_v17, 0.0 }
 0x3a2   : > { %v2298_v12 = vpack.c.bf16 %v2262_v10, %v2258_v9 }
 0x3a3   : > { %v2299_v13 = vpack.c.bf16 %v2263_v11, %v2259_v40  ;;  %v2199_v14 = vpop.f32.mrb[92].mxu1 }
 0x3a4   : > { %v2200_v58 = vadd.f32 %v2199_v14, %v4690_v44  ;;  %v2201_v24 = vpop.f32.mrb[93].mxu1 }
 0x3a5   : > { %v2202_v15 = vadd.f32 %v2201_v24, %v4695_v46  ;;  %v2203_v55 = vpop.f32.mrb[94].mxu1  ;;  %2744 = vmatprep.mubr.bf16.mxu1 %v2299_v13 }
 0x3a6   : > { %v2204_v33 = vadd.f32 %v2203_v55, %v4690_v44  ;;  %v2205_v23 = vpop.f32.mrb[95].mxu1  ;;  %2745 = vmatmul.mubr.bf16.gmra.mrb[120].mxu1 %v2298_v12  ;;  %v2266_v26 = vmax.f32 %v2200_v58, 0.0  ;;  %v4756_v12 = vld [vmem:[%s4819_s8] ss:$0 sm:$0xff] }
 0x3a7   : > { %v2206_v25 = vadd.f32 %v2205_v23, %v4695_v46  ;;  %v2267_v30 = vmax.f32 %v2202_v15, 0.0 }
 0x3a8   : > { %v2270_v1 = vmax.f32 %v2204_v33, 0.0 }
 0x3a9   : > { %v2271_v34 = vmax.f32 %v2206_v25, 0.0 }
 0x3aa   : > { %v2302_v36 = vpack.c.bf16 %v2270_v1, %v2266_v26 }
 0x3ab   : > { %v2303_v3 = vpack.c.bf16 %v2271_v34, %v2267_v30 }
 0x3ad   : > { %2752 = vmatprep.mubr.bf16.mxu1 %v2303_v3 }
 0x3ae   : > { %2753 = vmatmul.mubr.bf16.gmra.mrb[124].mxu1 %v2302_v36 }
 0x409   : > { %v3233_v22 = vpop.f32.mrb[64].mxu0 }
 0x40a   : > { %v3234_v49 = vpop.f32.mrb[65].mxu0 }
 0x40b   : > { %v3235_v37 = vadd.f32 %v3234_v49, %v3233_v22  ;;  %v3236_v38 = vpop.f32.mrb[66].mxu0 }
 0x40c   : > { %v3237_v19 = vpop.f32.mrb[67].mxu0 }
 0x40d   : > { %v3238_v39 = vadd.f32 %v3237_v19, %v3236_v38  ;;  %v2602_v58 = vadd.f32 %v3235_v37, %v4756_v12 }
 0x40f   : > { %v2605_v33 = vadd.f32 %v3238_v39, %v4756_v12 }
 0x411   : > { %v3239_v41 = vpop.f32.mrb[68].mxu0 }
 0x412   : > { %v3240_v44 = vpop.f32.mrb[69].mxu0 }
 0x413   : > { %v3241_v42 = vadd.f32 %v3240_v44, %v3239_v41  ;;  %v3242_v52 = vpop.f32.mrb[70].mxu0 }
 0x414   : > { %v3243_v45 = vpop.f32.mrb[71].mxu0 }
 0x415   : > { %v3244_v46 = vadd.f32 %v3243_v45, %v3242_v52  ;;  %v2610_v22 = vadd.f32 %v3241_v42, %v4756_v12 }
 0x417   : > { %v2613_v41 = vadd.f32 %v3244_v46, %v4756_v12 }
 0x419   : > { %v3245_v47 = vpop.f32.mrb[72].mxu0 }
 0x41a   : > { %v3246_v21 = vpop.f32.mrb[73].mxu0 }
 0x41b   : > { %v4729_v2 = vadd.f32 %v3246_v21, %v3245_v47  ;;  %v3248_v0 = vpop.f32.mrb[74].mxu0 }
 0x41c   : > { %v3249_v62 = vpop.f32.mrb[75].mxu0 }
 0x41d   : > { %v4731_v6 = vadd.f32 %v3249_v62, %v3248_v0 }
 0x41f   : > { %v2621_v46 = vadd.f32 %v4731_v6, %v4756_v12 }
 0x421   : > { %v3251_v18 = vpop.f32.mrb[76].mxu0 }
 0x422   : > { %v3252_v51 = vpop.f32.mrb[77].mxu0 }
 0x423   : > { %v4733_v16 = vadd.f32 %v3252_v51, %v3251_v18  ;;  %v3254_v20 = vpop.f32.mrb[78].mxu0  ;;  %v2618_v18 = vadd.f32 %v4729_v2, %v4756_v12 }
 0x424   : > { %v3255_v28 = vpop.f32.mrb[79].mxu0 }
 0x425   : > { %v4735_v27 = vadd.f32 %v3255_v28, %v3254_v20 }
 0x429   : > { %v3257_v56 = vpop.f32.mrb[80].mxu0 }
 0x42a   : > { %v3258_v48 = vpop.f32.mrb[81].mxu0 }
 0x42b   : > { %v4737_v35 = vadd.f32 %v3258_v48, %v3257_v56  ;;  %v3260_v50 = vpop.f32.mrb[82].mxu0 }
 0x42c   : > { %v3261_v53 = vpop.f32.mrb[83].mxu0 }
 0x42d   : > { %v4739_v54 = vadd.f32 %v3261_v53, %v3260_v50 }
 0x431   : > { %v3263_v57 = vpop.f32.mrb[84].mxu0 }
 0x432   : > { %v3264_v59 = vpop.f32.mrb[85].mxu0 }
 0x433   : > { %v4741_v29 = vadd.f32 %v3264_v59, %v3263_v57  ;;  %v3266_v60 = vpop.f32.mrb[86].mxu0 }
 0x434   : > { %v3267_v61 = vpop.f32.mrb[87].mxu0 }
 0x435   : > { %v4743_v63 = vadd.f32 %v3267_v61, %v3266_v60 }
 0x439   : > { %v3269_v31 = vpop.f32.mrb[88].mxu0 }
 0x43a   : > { %v3270_v32 = vpop.f32.mrb[89].mxu0 }
 0x43b   : > { %v4745_v43 = vadd.f32 %v3270_v32, %v3269_v31  ;;  %v3272_v4 = vpop.f32.mrb[90].mxu0 }
 0x43c   : > { %v3273_v5 = vpop.f32.mrb[91].mxu0 }
 0x43d   : > { %v4747_v7 = vadd.f32 %v3273_v5, %v3272_v4  ;;  %v2626_v5 = vadd.f32 %v4733_v16, %v4756_v12 }
 0x441   : > { %v3275_v8 = vpop.f32.mrb[92].mxu0 }
 0x442   : > { %v3276_v17 = vpop.f32.mrb[93].mxu0 }
 0x443   : > { %v4749_v9 = vadd.f32 %v3276_v17, %v3275_v8  ;;  %v3278_v10 = vpop.f32.mrb[94].mxu0 }
 0x444   : > { %v3279_v40 = vpop.f32.mrb[95].mxu0 }
 0x445   : > { %v4751_v11 = vadd.f32 %v3279_v40, %v3278_v10 }
 0x449   : > { %v3297_v13 = vpop.f32.mrb[96].mxu1 }
 0x44a   : > { %v3298_v14 = vpop.f32.mrb[97].mxu1 }
 0x44b   : > { %v3299_v24 = vadd.f32 %v3298_v14, %v3297_v13  ;;  %v3300_v15 = vpop.f32.mrb[98].mxu1  ;;  %v2629_v13 = vadd.f32 %v4735_v27, %v4756_v12 }
 0x44c   : > { %v3301_v55 = vpop.f32.mrb[99].mxu1 }
 0x44d   : > { %v2699_v23 = vadd.f32 %v3299_v24, %v2602_v58  ;;  %v3302_v25 = vadd.f32 %v3301_v55, %v3300_v15 }
 0x44f   : > { %v2761_v26 = vsub.f32 0.0, %v2699_v23  ;;  %v2702_v1 = vadd.f32 %v3302_v25, %v2605_v33 }
 0x451   : > { %v2777_v30 = vmul.f32 1.442695, %v2761_v26  ;;  %v2762_v34 = vsub.f32 0.0, %v2702_v1  ;;  %v3303_v36 = vpop.f32.mrb[100].mxu1 }
 0x452   : > { %v3304_v3 = vpop.f32.mrb[101].mxu1 }
 0x453   : > { %3687 = vpow2.f32 %v2777_v30  ;;  %v2779_v49 = vmul.f32 1.442695, %v2762_v34  ;;  %v3305_v38 = vadd.f32 %v3304_v3, %v3303_v36  ;;  %v3306_v19 = vpop.f32.mrb[102].mxu1  ;;  %v2634_v30 = vadd.f32 %v4737_v35, %v4756_v12 }
 0x454   : > { %v3307_v37 = vpop.f32.mrb[103].mxu1 }
 0x455   : > { %3689 = vpow2.f32 %v2779_v49  ;;  %v2707_v44 = vadd.f32 %v3305_v38, %v2610_v22  ;;  %v3308_v39 = vadd.f32 %v3307_v37, %v3306_v19  ;;  %v2637_v19 = vadd.f32 %v4739_v54, %v4756_v12 }
 0x456   : > { %v2642_v54 = vadd.f32 %v4741_v29, %v4756_v12 }
 0x457   : > { %v2763_v52 = vsub.f32 0.0, %v2707_v44  ;;  %v2710_v45 = vadd.f32 %v3308_v39, %v2613_v41 }
 0x459   : > { %v2781_v47 = vmul.f32 1.442695, %v2763_v52  ;;  %v2764_v21 = vsub.f32 0.0, %v2710_v45  ;;  %v3309_v0 = vpop.f32.mrb[104].mxu1 }
 0x45a   : > { %v3310_v62 = vpop.f32.mrb[105].mxu1 }
 0x45b   : > { %3691 = vpow2.f32 %v2781_v47  ;;  %v2783_v42 = vmul.f32 1.442695, %v2764_v21  ;;  %v3311_v51 = vadd.f32 %v3310_v62, %v3309_v0  ;;  %v3312_v20 = vpop.f32.mrb[106].mxu1 }
 0x45c   : > { %v3313_v28 = vpop.f32.mrb[107].mxu1 }
 0x45d   : > { %v3688_v56 = vpop.eup %3687  ;;  %3693 = vpow2.f32 %v2783_v42  ;;  %v2715_v48 = vadd.f32 %v3311_v51, %v2618_v18  ;;  %v3314_v50 = vadd.f32 %v3313_v28, %v3312_v20 }
 0x45e   : > { %v2809_v53 = vadd.f32 1.0, %v3688_v56 }
 0x45f   : > { %v3690_v57 = vpop.eup %3689  ;;  %v2765_v59 = vsub.f32 0.0, %v2715_v48  ;;  %v2718_v60 = vadd.f32 %v3314_v50, %v2621_v46  ;;  %v2645_v48 = vadd.f32 %v4743_v63, %v4756_v12  ;;  %v2650_v63 = vadd.f32 %v4745_v43, %v4756_v12 }
 0x460   : > { %3695 = vrcp.f32 %v2809_v53  ;;  %v2810_v61 = vadd.f32 1.0, %v3690_v57 }
 0x461   : > { %v2785_v31 = vmul.f32 1.442695, %v2765_v59  ;;  %v2766_v2 = vsub.f32 0.0, %v2718_v60  ;;  %v3315_v32 = vpop.f32.mrb[108].mxu1 }
 0x462   : > { %3697 = vrcp.f32 %v2810_v61  ;;  %v3316_v4 = vpop.f32.mrb[109].mxu1 }
 0x463   : > { %3699 = vpow2.f32 %v2785_v31  ;;  %v2787_v6 = vmul.f32 1.442695, %v2766_v2  ;;  %v3317_v8 = vadd.f32 %v3316_v4, %v3315_v32  ;;  %v3318_v17 = vpop.f32.mrb[110].mxu1 }
 0x464   : > { %v3319_v10 = vpop.f32.mrb[111].mxu1 }
 0x465   : > { %v3692_v40 = vpop.eup %3691  ;;  %3701 = vpow2.f32 %v2787_v6  ;;  %v2723_v14 = vadd.f32 %v3317_v8, %v2626_v5  ;;  %v3320_v58 = vadd.f32 %v3319_v10, %v3318_v17 }
 0x466   : > { %v2811_v24 = vadd.f32 1.0, %v3692_v40 }
 0x467   : > { %v3694_v15 = vpop.eup %3693  ;;  %v2767_v55 = vsub.f32 0.0, %v2723_v14  ;;  %v2726_v33 = vadd.f32 %v3320_v58, %v2629_v13  ;;  %v2653_v14 = vadd.f32 %v4747_v7, %v4756_v12  ;;  %v2658_v7 = vadd.f32 %v4749_v9, %v4756_v12 }
 0x468   : > { %3703 = vrcp.f32 %v2811_v24  ;;  %v2812_v16 = vadd.f32 1.0, %v3694_v15 }
 0x469   : > { %v2789_v23 = vmul.f32 1.442695, %v2767_v55  ;;  %v2768_v25 = vsub.f32 0.0, %v2726_v33  ;;  %v3321_v26 = vpop.f32.mrb[112].mxu1 }
 0x46a   : > { %v3696_v27 = vpop.eup %3695  ;;  %3705 = vrcp.f32 %v2812_v16  ;;  %v3322_v1 = vpop.f32.mrb[113].mxu1 }
 0x46b   : > { %2841 = vst [vmem:[%s4774_s19] sm:$0xff] %v3696_v27  ;;  %3707 = vpow2.f32 %v2789_v23  ;;  %v2791_v34 = vmul.f32 1.442695, %v2768_v25  ;;  %v3323_v36 = vadd.f32 %v3322_v1, %v3321_v26  ;;  %v3324_v3 = vpop.f32.mrb[114].mxu1 }
 0x46c   : > { %v3698_v22 = vpop.eup %3697  ;;  %v3325_v49 = vpop.f32.mrb[115].mxu1 }
 0x46d   : > { %v3700_v38 = vpop.eup %3699  ;;  %2842 = vst [vmem:[%s4774_s19 + $0x8] sm:$0xff] %v3698_v22  ;;  %3709 = vpow2.f32 %v2791_v34  ;;  %v2731_v37 = vadd.f32 %v3323_v36, %v2634_v30  ;;  %v3326_v41 = vadd.f32 %v3325_v49, %v3324_v3 }
 0x46e   : > { %v2813_v44 = vadd.f32 1.0, %v3700_v38  ;;  %v2661_v38 = vadd.f32 %v4751_v11, %v4756_v12 }
 0x46f   : > { %v3702_v39 = vpop.eup %3701  ;;  %v2769_v52 = vsub.f32 0.0, %v2731_v37  ;;  %v2734_v35 = vadd.f32 %v3326_v41, %v2637_v19 }
 0x470   : > { %3711 = vrcp.f32 %v2813_v44  ;;  %v2814_v45 = vadd.f32 1.0, %v3702_v39 }
 0x471   : > { %v2793_v47 = vmul.f32 1.442695, %v2769_v52  ;;  %v2770_v21 = vsub.f32 0.0, %v2734_v35  ;;  %v3327_v0 = vpop.f32.mrb[116].mxu1 }
 0x472   : > { %v3704_v62 = vpop.eup %3703  ;;  %3713 = vrcp.f32 %v2814_v45  ;;  %v3328_v18 = vpop.f32.mrb[117].mxu1 }
 0x473   : > { %2843 = vst [vmem:[%s4774_s19 + $0x10] sm:$0xff] %v3704_v62  ;;  %3715 = vpow2.f32 %v2793_v47  ;;  %v2795_v42 = vmul.f32 1.442695, %v2770_v21  ;;  %v3329_v51 = vadd.f32 %v3328_v18, %v3327_v0  ;;  %v3330_v20 = vpop.f32.mrb[118].mxu1 }
 0x474   : > { %v3706_v28 = vpop.eup %3705  ;;  %v3331_v56 = vpop.f32.mrb[119].mxu1 }
 0x475   : > { %v3708_v46 = vpop.eup %3707  ;;  %2844 = vst [vmem:[%s4774_s19 + $0x18] sm:$0xff] %v3706_v28  ;;  %3717 = vpow2.f32 %v2795_v42  ;;  %v2739_v50 = vadd.f32 %v3329_v51, %v2642_v54  ;;  %v3332_v53 = vadd.f32 %v3331_v56, %v3330_v20 }
 0x476   : > { %v2815_v57 = vadd.f32 1.0, %v3708_v46 }
 0x477   : > { %v3710_v59 = vpop.eup %3709  ;;  %v2771_v60 = vsub.f32 0.0, %v2739_v50  ;;  %v2742_v29 = vadd.f32 %v3332_v53, %v2645_v48 }
 0x478   : > { %3719 = vrcp.f32 %v2815_v57  ;;  %v2816_v61 = vadd.f32 1.0, %v3710_v59 }
 0x479   : > { %v2797_v31 = vmul.f32 1.442695, %v2771_v60  ;;  %v2772_v2 = vsub.f32 0.0, %v2742_v29  ;;  %v3333_v32 = vpop.f32.mrb[120].mxu1 }
 0x47a   : > { %v3712_v4 = vpop.eup %3711  ;;  %3721 = vrcp.f32 %v2816_v61  ;;  %v3334_v5 = vpop.f32.mrb[121].mxu1 }
 0x47b   : > { %2845 = vst [vmem:[%s4774_s19 + $0x20] sm:$0xff] %v3712_v4  ;;  %3723 = vpow2.f32 %v2797_v31  ;;  %v2799_v6 = vmul.f32 1.442695, %v2772_v2  ;;  %v3335_v8 = vadd.f32 %v3334_v5, %v3333_v32  ;;  %v3336_v17 = vpop.f32.mrb[122].mxu1 }
 0x47c   : > { %v3714_v10 = vpop.eup %3713  ;;  %v3337_v40 = vpop.f32.mrb[123].mxu1 }
 0x47d   : > { %v3716_v13 = vpop.eup %3715  ;;  %2846 = vst [vmem:[%s4774_s19 + $0x28] sm:$0xff] %v3714_v10  ;;  %3725 = vpow2.f32 %v2799_v6  ;;  %v2747_v58 = vadd.f32 %v3335_v8, %v2650_v63  ;;  %v3338_v24 = vadd.f32 %v3337_v40, %v3336_v17 }
 0x47e   : > { %v2817_v15 = vadd.f32 1.0, %v3716_v13 }
 0x47f   : > { %v3718_v55 = vpop.eup %3717  ;;  %v2773_v33 = vsub.f32 0.0, %v2747_v58  ;;  %v2750_v43 = vadd.f32 %v3338_v24, %v2653_v14 }
 0x480   : > { %3727 = vrcp.f32 %v2817_v15  ;;  %v2818_v16 = vadd.f32 1.0, %v3718_v55 }
 0x481   : > { %v2801_v23 = vmul.f32 1.442695, %v2773_v33  ;;  %v2774_v25 = vsub.f32 0.0, %v2750_v43  ;;  %v3339_v26 = vpop.f32.mrb[124].mxu1 }
 0x482   : > { %v3720_v27 = vpop.eup %3719  ;;  %3729 = vrcp.f32 %v2818_v16  ;;  %v3340_v1 = vpop.f32.mrb[125].mxu1 }
 0x483   : > { %2847 = vst [vmem:[%s4774_s19 + $0x30] sm:$0xff] %v3720_v27  ;;  %3731 = vpow2.f32 %v2801_v23  ;;  %v2803_v30 = vmul.f32 1.442695, %v2774_v25  ;;  %v3341_v34 = vadd.f32 %v3340_v1, %v3339_v26  ;;  %v3342_v36 = vpop.f32.mrb[126].mxu1 }
 0x484   : > { %v3722_v3 = vpop.eup %3721  ;;  %v3343_v22 = vpop.f32.mrb[127].mxu1 }
 0x485   : > { %v3724_v49 = vpop.eup %3723  ;;  %2848 = vst [vmem:[%s4774_s19 + $0x38] sm:$0xff] %v3722_v3  ;;  %3733 = vpow2.f32 %v2803_v30  ;;  %v2755_v19 = vadd.f32 %v3341_v34, %v2658_v7  ;;  %v3344_v37 = vadd.f32 %v3343_v22, %v3342_v36 }
 0x486   : > { %v2819_v41 = vadd.f32 1.0, %v3724_v49 }
 0x487   : > { %v3726_v44 = vpop.eup %3725  ;;  %v2775_v9 = vsub.f32 0.0, %v2755_v19  ;;  %v2758_v39 = vadd.f32 %v3344_v37, %v2661_v38 }
 0x488   : > { %3735 = vrcp.f32 %v2819_v41  ;;  %v2820_v52 = vadd.f32 1.0, %v3726_v44 }
 0x489   : > { %v2805_v35 = vmul.f32 1.442695, %v2775_v9  ;;  %v2776_v45 = vsub.f32 0.0, %v2758_v39 }
 0x48a   : > { %v3728_v47 = vpop.eup %3727  ;;  %3737 = vrcp.f32 %v2820_v52 }
 0x48b   : > { %2849 = vst [vmem:[%s4774_s19 + $0x40] sm:$0xff] %v3728_v47  ;;  %3739 = vpow2.f32 %v2805_v35  ;;  %v2807_v11 = vmul.f32 1.442695, %v2776_v45 }
 0x48c   : > { %v3730_v12 = vpop.eup %3729 }
 0x48d   : > { %v3732_v21 = vpop.eup %3731  ;;  %2850 = vst [vmem:[%s4774_s19 + $0x48] sm:$0xff] %v3730_v12  ;;  %3741 = vpow2.f32 %v2807_v11 }
 0x48e   : > { %v2821_v0 = vadd.f32 1.0, %v3732_v21 }
 0x48f   : > { %v3734_v62 = vpop.eup %3733 }
 0x490   : > { %3743 = vrcp.f32 %v2821_v0  ;;  %v2822_v18 = vadd.f32 1.0, %v3734_v62 }
 0x492   : > { %v3736_v54 = vpop.eup %3735  ;;  %3745 = vrcp.f32 %v2822_v18 }
 0x493   : > { %2851 = vst [vmem:[%s4774_s19 + $0x50] sm:$0xff] %v3736_v54 }
 0x494   : > { %v3738_v42 = vpop.eup %3737 }
 0x495   : > { %v3740_v51 = vpop.eup %3739  ;;  %2852 = vst [vmem:[%s4774_s19 + $0x58] sm:$0xff] %v3738_v42 }
 0x496   : > { %v2823_v20 = vadd.f32 1.0, %v3740_v51 }
 0x497   : > { %v3742_v28 = vpop.eup %3741 }
 0x498   : > { %3747 = vrcp.f32 %v2823_v20  ;;  %v2824_v56 = vadd.f32 1.0, %v3742_v28 }
 0x49a   : > { %v3744_v46 = vpop.eup %3743  ;;  %3749 = vrcp.f32 %v2824_v56 }
 0x49b   : > { %2853 = vst [vmem:[%s4774_s19 + $0x60] sm:$0xff] %v3744_v46 }
 0x49c   : > { %v3746_v48 = vpop.eup %3745 }
 0x49d   : > { %2854 = vst [vmem:[%s4774_s19 + $0x68] sm:$0xff] %v3746_v48 }
 0x4a2   : > { %v3748_v50 = vpop.eup %3747 }
 0x4a3   : > { %2855 = vst [vmem:[%s4774_s19 + $0x70] sm:$0xff] %v3748_v50 }
 0x4a4   : > { %v3750_v53 = vpop.eup %3749 }
 0x4a5   : > { %2856 = vst [vmem:[%s4774_s19 + $0x78] sm:$0xff] %v3750_v53 }
 0x4a6 PF: > { %s24_s21 = sadd.s32 1, %s3789_s21  }
 0x4a7   : > { %p21_p3 = scmp.ge.s32.totalorder %s24_s21, 4  }
 0x4a9   :  { %23 = sbr.rel (!%p21_p3) target bundleno = 1 (0x1), region = 122 }
 0x4b0   :  { %2945 = vsyncpa [#allocation3], 1 }
 0x4b1   :  { %2947 = vsyncpa [#allocation3 + $0x1], 1 }

</bundles_post_ra>
